<compile_context>
chip_gen: v7x
topology: tpu7x:2x2x1
jax: 0.10.0
libtpu: 0.0.40
codegen_flags: <defaults>
</compile_context>

<pallas_src>
import functools

import jax
import jax.numpy as jnp
from jax import lax
from jax.experimental import pallas as pl
from jax.experimental.pallas import tpu as pltpu

MID1, MID2 = 16, 32   # encoder channel widths


# ----------------------------------------------------------------------------
# Fused Pallas kernel: conv3x3 -> grouped conv3x3 -> conv3x3 -> 1x1 head
# ----------------------------------------------------------------------------
def make_fused_mfnet(N, H, W, Cin, C1, C2, NC, out_dtype=jnp.float32):
    Hp, Wp = H + 2, W + 2
    L = Hp * Wp                      # flattened padded image = lane axis

    def kernel(x_ref, w1_ref, s1_ref, b1_ref, w2_ref, s2_ref, b2_ref,
               w3_ref, s3_ref, b3_ref, wc_ref, bc_ref, m_ref,
               feat_ref, pred_ref):
        mask = m_ref[...]                                    # (1, L) f32

        def shift_left(a, t):
            # y[:, p] = a[:, (p + t) % L] for a static python int t.
            # Wrapped entries can only land in halo positions, which are
            # re-zeroed by `mask` below, so the wrap is harmless.
            if t == 0:
                return a
            return jnp.concatenate([a[:, t:], a[:, :t]], axis=1)

        def conv3x3_bn_relu(a_bf16, w_ref_, s_ref_, b_ref_):
            # a: (Cin_l, L) bf16;  w: (9, Cout_l, Cin_l) bf16.
            # Nine small MXU dots accumulated in f32 -- no lane concatenation.
            acc = None
            for kh in range(3):
                for kw in range(3):
                    t = (kh - 1) * Wp + (kw - 1)
                    y = jnp.dot(w_ref_[kh * 3 + kw], shift_left(a_bf16, t),
                                preferred_element_type=jnp.float32)
                    acc = y if acc is None else acc + y
            # Folded BN + ReLU in f32 (v5e-safe).  The mask re-zeros the 1-px
            # halo ring, reproducing PyTorch padding=1 for the next layer.
            return jnp.maximum(acc * s_ref_[...] + b_ref_[...], 0.0) * mask

        x = x_ref[...].astype(jnp.bfloat16)                  # (Cin, L)
        h1 = conv3x3_bn_relu(x, w1_ref, s1_ref, b1_ref)                 # (C1, L)
        h2 = conv3x3_bn_relu(h1.astype(jnp.bfloat16), w2_ref, s2_ref, b2_ref)
        feat = conv3x3_bn_relu(h2.astype(jnp.bfloat16), w3_ref, s3_ref, b3_ref)

        # 1x1 classification head
        pred = jnp.dot(wc_ref[...], feat.astype(jnp.bfloat16),
                       preferred_element_type=jnp.float32) + bc_ref[...]

        feat_ref[...] = feat.astype(feat_ref.dtype)          # lane-dense stores
        pred_ref[...] = pred.astype(pred_ref.dtype)

    def const_spec(shape):
        zeros = (0,) * len(shape)
        return pl.BlockSpec(shape, lambda n: zeros)          # VMEM-resident

    in_specs = [
        pl.BlockSpec((None, Cin, L), lambda n: (n, 0, 0)),   # x padded slab
        const_spec((9, C1, Cin)), const_spec((C1, 1)), const_spec((C1, 1)),
        const_spec((9, C1, C1)), const_spec((C1, 1)), const_spec((C1, 1)),
        const_spec((9, C2, C1)), const_spec((C2, 1)), const_spec((C2, 1)),
        const_spec((NC, C2)), const_spec((NC, 1)),
        const_spec((1, L)),                                  # halo-zero mask
    ]
    out_specs = (pl.BlockSpec((None, C2, L), lambda n: (n, 0, 0)),
                 pl.BlockSpec((None, NC, L), lambda n: (n, 0, 0)))
    out_shape = (jax.ShapeDtypeStruct((N, C2, L), out_dtype),
                 jax.ShapeDtypeStruct((N, NC, L), out_dtype))

    flops = 2 * N * L * (9 * (Cin * C1 + C1 * C1 + C1 * C2) + C2 * NC)
    bytes_accessed = (4 * N * L * (Cin + C2 + NC)
                      + 2 * 9 * (Cin * C1 + C1 * C1 + C1 * C2)
                      + 2 * C2 * NC + 4 * L)

    call = pl.pallas_call(
        kernel,
        out_shape=out_shape,
        grid=(N,),
        in_specs=in_specs,
        out_specs=out_specs,
        compiler_params=pltpu.CompilerParams(
            dimension_semantics=("parallel",),       # both v7x TCs get an image
            vmem_limit_bytes=32 * 1024 * 1024),
        cost_estimate=pl.CostEstimate(flops=flops, transcendentals=0,
                                      bytes_accessed=bytes_accessed),
    )

    def apply(x_slab, params, mask):
        return call(x_slab,
                    params["w1"], params["s1"], params["b1"],
                    params["w2"], params["s2"], params["b2"],
                    params["w3"], params["s3"], params["b3"],
                    params["wc"], params["bc"], mask)

    return apply


# ----------------------------------------------------------------------------
# Parameters (deterministic, synthetic) + wrapper
# ----------------------------------------------------------------------------
def fold_bn(gamma, beta, mean, var, eps=1e-5):
    scale = gamma / jnp.sqrt(var + eps)
    bias = beta - mean * scale
    return (scale.reshape(-1, 1).astype(jnp.float32),
            bias.reshape(-1, 1).astype(jnp.float32))


def conv_taps(w_hwio):
    """(3,3,Cin,Cout) -> (9, Cout, Cin) bf16 tap weights, order k = kh*3 + kw."""
    cin, cout = w_hwio.shape[2], w_hwio.shape[3]
    return (jnp.transpose(w_hwio, (0, 1, 3, 2))
            .reshape(9, cout, cin).astype(jnp.bfloat16))


def init_params(in_ch=4, mid1=MID1, mid2=MID2, num_classes=4, groups=4):
    keys = jax.random.split(jax.random.PRNGKey(0), 4)
    p = {}
    # conv1: in_ch -> mid1
    w1 = 0.1 * jax.random.normal(keys[0], (3, 3, in_ch, mid1), jnp.float32)
    p["w1"] = conv_taps(w1)
    p["s1"], p["b1"] = fold_bn(jnp.ones(mid1) * 1.1, jnp.ones(mid1) * 0.01,
                               jnp.ones(mid1) * 0.02, jnp.ones(mid1) * 0.9)
    # multi-fiber grouped conv (groups=4), stored as dense block-diagonal taps
    cg = mid1 // groups
    w2g = 0.1 * jax.random.normal(keys[1], (groups, 3, 3, cg, cg), jnp.float32)
    w2d = jnp.zeros((3, 3, mid1, mid1), jnp.float32)
    for g in range(groups):
        w2d = w2d.at[:, :, g * cg:(g + 1) * cg, g * cg:(g + 1) * cg].set(w2g[g])
    p["w2"] = conv_taps(w2d)
    p["s2"], p["b2"] = fold_bn(jnp.ones(mid1) * 0.95, jnp.ones(mid1) * -0.01,
                               jnp.ones(mid1) * 0.03, jnp.ones(mid1) * 1.05)
    # conv3: mid1 -> mid2
    w3 = 0.1 * jax.random.normal(keys[2], (3, 3, mid1, mid2), jnp.float32)
    p["w3"] = conv_taps(w3)
    p["s3"], p["b3"] = fold_bn(jnp.ones(mid2) * 1.05, jnp.ones(mid2) * 0.02,
                               jnp.ones(mid2) * -0.01, jnp.ones(mid2) * 0.98)
    # cls head: 1x1 conv mid2 -> num_classes
    p["wc"] = (0.1 * jax.random.normal(keys[3], (num_classes, mid2),
                                       jnp.float32)).astype(jnp.bfloat16)
    p["bc"] = 0.01 * jnp.ones((num_classes, 1), jnp.float32)
    return p


def mfnet_baseline_forward(x_nchw, params, num_classes=4):
    """Mirrors MFNet_Baseline_model.forward: returns {'pred', 'feature'} (NCHW)."""
    N, C, H, W = x_nchw.shape
    Hp, Wp = H + 2, W + 2
    L = Hp * Wp

    # 1-pixel zero halo, flattened onto the lane axis (stays channels-first).
    xp = jnp.pad(x_nchw, ((0, 0), (0, 0), (1, 1), (1, 1))).reshape(N, C, L)

    # Valid-region mask (1 inside the HxW image, 0 on the halo ring).
    ri = jnp.arange(Hp)
    ci = jnp.arange(Wp)
    mask2d = (((ri >= 1) & (ri <= H))[:, None]
              & ((ci >= 1) & (ci <= W))[None, :])
    mask = mask2d.astype(jnp.float32).reshape(1, L)

    apply = make_fused_mfnet(N, H, W, C, MID1, MID2, num_classes)
    feat_slab, pred_slab = apply(xp, params, mask)

    feat = feat_slab.reshape(N, MID2, Hp, Wp)[:, :, 1:H + 1, 1:W + 1]
    pred = pred_slab.reshape(N, num_classes, Hp, Wp)[:, :, 1:H + 1, 1:W + 1]
    return {"pred": pred, "feature": feat}


# ----------------------------------------------------------------------------
# Pure-JAX reference (same math, bf16-operand-aware) for a numerical self-check
# ----------------------------------------------------------------------------
def reference_forward(x_nchw, params, num_classes=4):
    def taps_to_oihw(w9):
        _, cout, cin = w9.shape
        w = w9.astype(jnp.float32).reshape(3, 3, cout, cin)
        return jnp.transpose(w, (2, 3, 0, 1))                # OIHW

    def conv_bn_relu(a, w9, s, b):
        a = a.astype(jnp.bfloat16).astype(jnp.float32)   # mirror MXU operand rounding
        y = lax.conv_general_dilated(
            a, taps_to_oihw(w9), (1, 1), "SAME",
            dimension_numbers=("NCHW", "OIHW", "NCHW"))
        return jnp.maximum(y * s.reshape(1, -1, 1, 1) + b.reshape(1, -1, 1, 1), 0.0)

    h = conv_bn_relu(x_nchw.astype(jnp.float32), params["w1"], params["s1"], params["b1"])
    h = conv_bn_relu(h, params["w2"], params["s2"], params["b2"])
    feat = conv_bn_relu(h, params["w3"], params["s3"], params["b3"])
    f_q = feat.astype(jnp.bfloat16).astype(jnp.float32)
    pred = jnp.einsum("oc,nchw->nohw", params["wc"].astype(jnp.float32), f_q) \
        + params["bc"].reshape(1, -1, 1, 1)
    return {"pred": pred, "feature": feat}


if __name__ == "__main__":
    N, C, H, W = 2, 4, 16, 16
    num_classes = 4

    x = jax.random.normal(jax.random.PRNGKey(0), (N, C, H, W), jnp.float32)
    params = init_params(in_ch=C, num_classes=num_classes)

    fwd = jax.jit(functools.partial(mfnet_baseline_forward,
                                    params=params, num_classes=num_classes))
    logits = fwd(x)
    jax.block_until_ready(logits)

    assert logits["pred"].shape == (N, num_classes, H, W)
    assert logits["feature"].shape == (N, MID2, H, W)
    assert jnp.all(jnp.isfinite(logits["pred"]))
    assert jnp.all(jnp.isfinite(logits["feature"]))

    ref = reference_forward(x, params, num_classes=num_classes)
    assert jnp.allclose(logits["feature"], ref["feature"], atol=1e-2, rtol=1e-2)
    assert jnp.allclose(logits["pred"], ref["pred"], atol=1e-2, rtol=1e-2)

    print("KERNEL_OK")
</pallas_src>

<mosaic_0001>
module attributes {stable_mosaic.version = 11 : i64} {
  func.func @kernel(%arg0: i32, %arg1: memref<1x4x324xf32, #tpu.memory_space<vmem>>, %arg2: memref<9x16x4xbf16, #tpu.memory_space<vmem>>, %arg3: memref<16x1xf32, #tpu.memory_space<vmem>>, %arg4: memref<16x1xf32, #tpu.memory_space<vmem>>, %arg5: memref<9x16x16xbf16, #tpu.memory_space<vmem>>, %arg6: memref<16x1xf32, #tpu.memory_space<vmem>>, %arg7: memref<16x1xf32, #tpu.memory_space<vmem>>, %arg8: memref<9x32x16xbf16, #tpu.memory_space<vmem>>, %arg9: memref<32x1xf32, #tpu.memory_space<vmem>>, %arg10: memref<32x1xf32, #tpu.memory_space<vmem>>, %arg11: memref<4x32xbf16, #tpu.memory_space<vmem>>, %arg12: memref<4x1xf32, #tpu.memory_space<vmem>>, %arg13: memref<1x324xf32, #tpu.memory_space<vmem>>, %arg14: memref<1x32x324xf32, #tpu.memory_space<vmem>>, %arg15: memref<1x4x324xf32, #tpu.memory_space<vmem>>) attributes {dimension_semantics = [#tpu.dimension_semantics<parallel>], iteration_bounds = array<i64: 2>, scalar_prefetch = 0 : i64, scratch_operands = 0 : i64, tpu.core_type = #tpu.core_type<tc>, window_params = [{transform_indices = @transform_0, window_bounds = array<i64: 1, 4, 324>}, {pipeline_mode = #tpu.pipeline_mode<synchronous>, transform_indices = @transform_1, window_bounds = array<i64: 9, 16, 4>}, {pipeline_mode = #tpu.pipeline_mode<synchronous>, transform_indices = @transform_2, window_bounds = array<i64: 16, 1>}, {pipeline_mode = #tpu.pipeline_mode<synchronous>, transform_indices = @transform_3, window_bounds = array<i64: 16, 1>}, {pipeline_mode = #tpu.pipeline_mode<synchronous>, transform_indices = @transform_4, window_bounds = array<i64: 9, 16, 16>}, {pipeline_mode = #tpu.pipeline_mode<synchronous>, transform_indices = @transform_5, window_bounds = array<i64: 16, 1>}, {pipeline_mode = #tpu.pipeline_mode<synchronous>, transform_indices = @transform_6, window_bounds = array<i64: 16, 1>}, {pipeline_mode = #tpu.pipeline_mode<synchronous>, transform_indices = @transform_7, window_bounds = array<i64: 9, 32, 16>}, {pipeline_mode = #tpu.pipeline_mode<synchronous>, transform_indices = @transform_8, window_bounds = array<i64: 32, 1>}, {pipeline_mode = #tpu.pipeline_mode<synchronous>, transform_indices = @transform_9, window_bounds = array<i64: 32, 1>}, {pipeline_mode = #tpu.pipeline_mode<synchronous>, transform_indices = @transform_10, window_bounds = array<i64: 4, 32>}, {pipeline_mode = #tpu.pipeline_mode<synchronous>, transform_indices = @transform_11, window_bounds = array<i64: 4, 1>}, {pipeline_mode = #tpu.pipeline_mode<synchronous>, transform_indices = @transform_12, window_bounds = array<i64: 1, 324>}, {transform_indices = @transform_13, window_bounds = array<i64: 1, 32, 324>}, {transform_indices = @transform_14, window_bounds = array<i64: 1, 4, 324>}]} {
    %c0 = arith.constant 0 : index
    %c0_0 = arith.constant 0 : index
    %0 = vector.load %arg13[%c0, %c0_0] : memref<1x324xf32, #tpu.memory_space<vmem>>, vector<1x324xf32>
    %c0_1 = arith.constant 0 : index
    %c0_2 = arith.constant 0 : index
    %c0_3 = arith.constant 0 : index
    %1 = vector.load %arg1[%c0_1, %c0_2, %c0_3] : memref<1x4x324xf32, #tpu.memory_space<vmem>>, vector<1x4x324xf32>
    %2 = vector.shape_cast %1 : vector<1x4x324xf32> to vector<4x324xf32>
    %3 = arith.truncf %2 : vector<4x324xf32> to vector<4x324xbf16>
    %c0_4 = arith.constant 0 : index
    %c0_5 = arith.constant 0 : index
    %c0_6 = arith.constant 0 : index
    %4 = vector.load %arg2[%c0_4, %c0_5, %c0_6] : memref<9x16x4xbf16, #tpu.memory_space<vmem>>, vector<1x16x4xbf16>
    %5 = vector.shape_cast %4 : vector<1x16x4xbf16> to vector<16x4xbf16>
    %6 = vector.extract_strided_slice %3 {offsets = [0, 305], sizes = [4, 19], strides = [1, 1]} : vector<4x324xbf16> to vector<4x19xbf16>
    %7 = vector.extract_strided_slice %3 {offsets = [0, 0], sizes = [4, 305], strides = [1, 1]} : vector<4x324xbf16> to vector<4x305xbf16>
    %8 = tpu.concatenate %6, %7 in 1 : vector<4x19xbf16>, vector<4x305xbf16> -> vector<4x324xbf16>
    %cst = arith.constant dense<0.000000e+00> : vector<16x324xf32>
    %9 = tpu.matmul %5, %8, %cst {dimension_numbers = #tpu.dot_dimension_numbers<[1], [0], [0], [1], [0, 0, 1, 1], [], []>} : vector<16x4xbf16>, vector<4x324xbf16>, vector<16x324xf32> -> vector<16x324xf32>
    %c1 = arith.constant 1 : index
    %c0_7 = arith.constant 0 : index
    %c0_8 = arith.constant 0 : index
    %10 = vector.load %arg2[%c1, %c0_7, %c0_8] : memref<9x16x4xbf16, #tpu.memory_space<vmem>>, vector<1x16x4xbf16>
    %11 = vector.shape_cast %10 : vector<1x16x4xbf16> to vector<16x4xbf16>
    %12 = vector.extract_strided_slice %3 {offsets = [0, 306], sizes = [4, 18], strides = [1, 1]} : vector<4x324xbf16> to vector<4x18xbf16>
    %13 = vector.extract_strided_slice %3 {offsets = [0, 0], sizes = [4, 306], strides = [1, 1]} : vector<4x324xbf16> to vector<4x306xbf16>
    %14 = tpu.concatenate %12, %13 in 1 : vector<4x18xbf16>, vector<4x306xbf16> -> vector<4x324xbf16>
    %cst_9 = arith.constant dense<0.000000e+00> : vector<16x324xf32>
    %15 = tpu.matmul %11, %14, %cst_9 {dimension_numbers = #tpu.dot_dimension_numbers<[1], [0], [0], [1], [0, 0, 1, 1], [], []>} : vector<16x4xbf16>, vector<4x324xbf16>, vector<16x324xf32> -> vector<16x324xf32>
    %16 = arith.addf %9, %15 : vector<16x324xf32>
    %c2 = arith.constant 2 : index
    %c0_10 = arith.constant 0 : index
    %c0_11 = arith.constant 0 : index
    %17 = vector.load %arg2[%c2, %c0_10, %c0_11] : memref<9x16x4xbf16, #tpu.memory_space<vmem>>, vector<1x16x4xbf16>
    %18 = vector.shape_cast %17 : vector<1x16x4xbf16> to vector<16x4xbf16>
    %19 = vector.extract_strided_slice %3 {offsets = [0, 307], sizes = [4, 17], strides = [1, 1]} : vector<4x324xbf16> to vector<4x17xbf16>
    %20 = vector.extract_strided_slice %3 {offsets = [0, 0], sizes = [4, 307], strides = [1, 1]} : vector<4x324xbf16> to vector<4x307xbf16>
    %21 = tpu.concatenate %19, %20 in 1 : vector<4x17xbf16>, vector<4x307xbf16> -> vector<4x324xbf16>
    %cst_12 = arith.constant dense<0.000000e+00> : vector<16x324xf32>
    %22 = tpu.matmul %18, %21, %cst_12 {dimension_numbers = #tpu.dot_dimension_numbers<[1], [0], [0], [1], [0, 0, 1, 1], [], []>} : vector<16x4xbf16>, vector<4x324xbf16>, vector<16x324xf32> -> vector<16x324xf32>
    %23 = arith.addf %16, %22 : vector<16x324xf32>
    %c3 = arith.constant 3 : index
    %c0_13 = arith.constant 0 : index
    %c0_14 = arith.constant 0 : index
    %24 = vector.load %arg2[%c3, %c0_13, %c0_14] : memref<9x16x4xbf16, #tpu.memory_space<vmem>>, vector<1x16x4xbf16>
    %25 = vector.shape_cast %24 : vector<1x16x4xbf16> to vector<16x4xbf16>
    %26 = vector.extract_strided_slice %3 {offsets = [0, 323], sizes = [4, 1], strides = [1, 1]} : vector<4x324xbf16> to vector<4x1xbf16>
    %27 = vector.extract_strided_slice %3 {offsets = [0, 0], sizes = [4, 323], strides = [1, 1]} : vector<4x324xbf16> to vector<4x323xbf16>
    %28 = tpu.concatenate %26, %27 in 1 : vector<4x1xbf16>, vector<4x323xbf16> -> vector<4x324xbf16>
    %cst_15 = arith.constant dense<0.000000e+00> : vector<16x324xf32>
    %29 = tpu.matmul %25, %28, %cst_15 {dimension_numbers = #tpu.dot_dimension_numbers<[1], [0], [0], [1], [0, 0, 1, 1], [], []>} : vector<16x4xbf16>, vector<4x324xbf16>, vector<16x324xf32> -> vector<16x324xf32>
    %30 = arith.addf %23, %29 : vector<16x324xf32>
    %c4 = arith.constant 4 : index
    %c0_16 = arith.constant 0 : index
    %c0_17 = arith.constant 0 : index
    %31 = vector.load %arg2[%c4, %c0_16, %c0_17] : memref<9x16x4xbf16, #tpu.memory_space<vmem>>, vector<1x16x4xbf16>
    %32 = vector.shape_cast %31 : vector<1x16x4xbf16> to vector<16x4xbf16>
    %cst_18 = arith.constant dense<0.000000e+00> : vector<16x324xf32>
    %33 = tpu.matmul %32, %3, %cst_18 {dimension_numbers = #tpu.dot_dimension_numbers<[1], [0], [0], [1], [0, 0, 1, 1], [], []>} : vector<16x4xbf16>, vector<4x324xbf16>, vector<16x324xf32> -> vector<16x324xf32>
    %34 = arith.addf %30, %33 : vector<16x324xf32>
    %c5 = arith.constant 5 : index
    %c0_19 = arith.constant 0 : index
    %c0_20 = arith.constant 0 : index
    %35 = vector.load %arg2[%c5, %c0_19, %c0_20] : memref<9x16x4xbf16, #tpu.memory_space<vmem>>, vector<1x16x4xbf16>
    %36 = vector.shape_cast %35 : vector<1x16x4xbf16> to vector<16x4xbf16>
    %37 = vector.extract_strided_slice %3 {offsets = [0, 1], sizes = [4, 323], strides = [1, 1]} : vector<4x324xbf16> to vector<4x323xbf16>
    %38 = vector.extract_strided_slice %3 {offsets = [0, 0], sizes = [4, 1], strides = [1, 1]} : vector<4x324xbf16> to vector<4x1xbf16>
    %39 = tpu.concatenate %37, %38 in 1 : vector<4x323xbf16>, vector<4x1xbf16> -> vector<4x324xbf16>
    %cst_21 = arith.constant dense<0.000000e+00> : vector<16x324xf32>
    %40 = tpu.matmul %36, %39, %cst_21 {dimension_numbers = #tpu.dot_dimension_numbers<[1], [0], [0], [1], [0, 0, 1, 1], [], []>} : vector<16x4xbf16>, vector<4x324xbf16>, vector<16x324xf32> -> vector<16x324xf32>
    %41 = arith.addf %34, %40 : vector<16x324xf32>
    %c6 = arith.constant 6 : index
    %c0_22 = arith.constant 0 : index
    %c0_23 = arith.constant 0 : index
    %42 = vector.load %arg2[%c6, %c0_22, %c0_23] : memref<9x16x4xbf16, #tpu.memory_space<vmem>>, vector<1x16x4xbf16>
    %43 = vector.shape_cast %42 : vector<1x16x4xbf16> to vector<16x4xbf16>
    %44 = vector.extract_strided_slice %3 {offsets = [0, 17], sizes = [4, 307], strides = [1, 1]} : vector<4x324xbf16> to vector<4x307xbf16>
    %45 = vector.extract_strided_slice %3 {offsets = [0, 0], sizes = [4, 17], strides = [1, 1]} : vector<4x324xbf16> to vector<4x17xbf16>
    %46 = tpu.concatenate %44, %45 in 1 : vector<4x307xbf16>, vector<4x17xbf16> -> vector<4x324xbf16>
    %cst_24 = arith.constant dense<0.000000e+00> : vector<16x324xf32>
    %47 = tpu.matmul %43, %46, %cst_24 {dimension_numbers = #tpu.dot_dimension_numbers<[1], [0], [0], [1], [0, 0, 1, 1], [], []>} : vector<16x4xbf16>, vector<4x324xbf16>, vector<16x324xf32> -> vector<16x324xf32>
    %48 = arith.addf %41, %47 : vector<16x324xf32>
    %c7 = arith.constant 7 : index
    %c0_25 = arith.constant 0 : index
    %c0_26 = arith.constant 0 : index
    %49 = vector.load %arg2[%c7, %c0_25, %c0_26] : memref<9x16x4xbf16, #tpu.memory_space<vmem>>, vector<1x16x4xbf16>
    %50 = vector.shape_cast %49 : vector<1x16x4xbf16> to vector<16x4xbf16>
    %51 = vector.extract_strided_slice %3 {offsets = [0, 18], sizes = [4, 306], strides = [1, 1]} : vector<4x324xbf16> to vector<4x306xbf16>
    %52 = vector.extract_strided_slice %3 {offsets = [0, 0], sizes = [4, 18], strides = [1, 1]} : vector<4x324xbf16> to vector<4x18xbf16>
    %53 = tpu.concatenate %51, %52 in 1 : vector<4x306xbf16>, vector<4x18xbf16> -> vector<4x324xbf16>
    %cst_27 = arith.constant dense<0.000000e+00> : vector<16x324xf32>
    %54 = tpu.matmul %50, %53, %cst_27 {dimension_numbers = #tpu.dot_dimension_numbers<[1], [0], [0], [1], [0, 0, 1, 1], [], []>} : vector<16x4xbf16>, vector<4x324xbf16>, vector<16x324xf32> -> vector<16x324xf32>
    %55 = arith.addf %48, %54 : vector<16x324xf32>
    %c8 = arith.constant 8 : index
    %c0_28 = arith.constant 0 : index
    %c0_29 = arith.constant 0 : index
    %56 = vector.load %arg2[%c8, %c0_28, %c0_29] : memref<9x16x4xbf16, #tpu.memory_space<vmem>>, vector<1x16x4xbf16>
    %57 = vector.shape_cast %56 : vector<1x16x4xbf16> to vector<16x4xbf16>
    %58 = vector.extract_strided_slice %3 {offsets = [0, 19], sizes = [4, 305], strides = [1, 1]} : vector<4x324xbf16> to vector<4x305xbf16>
    %59 = vector.extract_strided_slice %3 {offsets = [0, 0], sizes = [4, 19], strides = [1, 1]} : vector<4x324xbf16> to vector<4x19xbf16>
    %60 = tpu.concatenate %58, %59 in 1 : vector<4x305xbf16>, vector<4x19xbf16> -> vector<4x324xbf16>
    %cst_30 = arith.constant dense<0.000000e+00> : vector<16x324xf32>
    %61 = tpu.matmul %57, %60, %cst_30 {dimension_numbers = #tpu.dot_dimension_numbers<[1], [0], [0], [1], [0, 0, 1, 1], [], []>} : vector<16x4xbf16>, vector<4x324xbf16>, vector<16x324xf32> -> vector<16x324xf32>
    %62 = arith.addf %55, %61 : vector<16x324xf32>
    %c0_31 = arith.constant 0 : index
    %c0_32 = arith.constant 0 : index
    %63 = vector.load %arg3[%c0_31, %c0_32] : memref<16x1xf32, #tpu.memory_space<vmem>>, vector<16x1xf32>
    %64 = vector.broadcast %63 : vector<16x1xf32> to vector<16x324xf32>
    %65 = arith.mulf %62, %64 : vector<16x324xf32>
    %c0_33 = arith.constant 0 : index
    %c0_34 = arith.constant 0 : index
    %66 = vector.load %arg4[%c0_33, %c0_34] : memref<16x1xf32, #tpu.memory_space<vmem>>, vector<16x1xf32>
    %67 = vector.broadcast %66 : vector<16x1xf32> to vector<16x324xf32>
    %68 = arith.addf %65, %67 : vector<16x324xf32>
    %cst_35 = arith.constant 0.000000e+00 : f32
    %69 = vector.broadcast %cst_35 : f32 to vector<16x324xf32>
    %70 = arith.maximumf %68, %69 : vector<16x324xf32>
    %71 = vector.broadcast %0 : vector<1x324xf32> to vector<16x324xf32>
    %72 = arith.mulf %70, %71 : vector<16x324xf32>
    %73 = arith.truncf %72 : vector<16x324xf32> to vector<16x324xbf16>
    %c0_36 = arith.constant 0 : index
    %c0_37 = arith.constant 0 : index
    %c0_38 = arith.constant 0 : index
    %74 = vector.load %arg5[%c0_36, %c0_37, %c0_38] : memref<9x16x16xbf16, #tpu.memory_space<vmem>>, vector<1x16x16xbf16>
    %75 = vector.shape_cast %74 : vector<1x16x16xbf16> to vector<16x16xbf16>
    %76 = vector.extract_strided_slice %73 {offsets = [0, 305], sizes = [16, 19], strides = [1, 1]} : vector<16x324xbf16> to vector<16x19xbf16>
    %77 = vector.extract_strided_slice %73 {offsets = [0, 0], sizes = [16, 305], strides = [1, 1]} : vector<16x324xbf16> to vector<16x305xbf16>
    %78 = tpu.concatenate %76, %77 in 1 : vector<16x19xbf16>, vector<16x305xbf16> -> vector<16x324xbf16>
    %cst_39 = arith.constant dense<0.000000e+00> : vector<16x324xf32>
    %79 = tpu.matmul %75, %78, %cst_39 {dimension_numbers = #tpu.dot_dimension_numbers<[1], [0], [0], [1], [0, 0, 1, 1], [], []>} : vector<16x16xbf16>, vector<16x324xbf16>, vector<16x324xf32> -> vector<16x324xf32>
    %c1_40 = arith.constant 1 : index
    %c0_41 = arith.constant 0 : index
    %c0_42 = arith.constant 0 : index
    %80 = vector.load %arg5[%c1_40, %c0_41, %c0_42] : memref<9x16x16xbf16, #tpu.memory_space<vmem>>, vector<1x16x16xbf16>
    %81 = vector.shape_cast %80 : vector<1x16x16xbf16> to vector<16x16xbf16>
    %82 = vector.extract_strided_slice %73 {offsets = [0, 306], sizes = [16, 18], strides = [1, 1]} : vector<16x324xbf16> to vector<16x18xbf16>
    %83 = vector.extract_strided_slice %73 {offsets = [0, 0], sizes = [16, 306], strides = [1, 1]} : vector<16x324xbf16> to vector<16x306xbf16>
    %84 = tpu.concatenate %82, %83 in 1 : vector<16x18xbf16>, vector<16x306xbf16> -> vector<16x324xbf16>
    %cst_43 = arith.constant dense<0.000000e+00> : vector<16x324xf32>
    %85 = tpu.matmul %81, %84, %cst_43 {dimension_numbers = #tpu.dot_dimension_numbers<[1], [0], [0], [1], [0, 0, 1, 1], [], []>} : vector<16x16xbf16>, vector<16x324xbf16>, vector<16x324xf32> -> vector<16x324xf32>
    %86 = arith.addf %79, %85 : vector<16x324xf32>
    %c2_44 = arith.constant 2 : index
    %c0_45 = arith.constant 0 : index
    %c0_46 = arith.constant 0 : index
    %87 = vector.load %arg5[%c2_44, %c0_45, %c0_46] : memref<9x16x16xbf16, #tpu.memory_space<vmem>>, vector<1x16x16xbf16>
    %88 = vector.shape_cast %87 : vector<1x16x16xbf16> to vector<16x16xbf16>
    %89 = vector.extract_strided_slice %73 {offsets = [0, 307], sizes = [16, 17], strides = [1, 1]} : vector<16x324xbf16> to vector<16x17xbf16>
    %90 = vector.extract_strided_slice %73 {offsets = [0, 0], sizes = [16, 307], strides = [1, 1]} : vector<16x324xbf16> to vector<16x307xbf16>
    %91 = tpu.concatenate %89, %90 in 1 : vector<16x17xbf16>, vector<16x307xbf16> -> vector<16x324xbf16>
    %cst_47 = arith.constant dense<0.000000e+00> : vector<16x324xf32>
    %92 = tpu.matmul %88, %91, %cst_47 {dimension_numbers = #tpu.dot_dimension_numbers<[1], [0], [0], [1], [0, 0, 1, 1], [], []>} : vector<16x16xbf16>, vector<16x324xbf16>, vector<16x324xf32> -> vector<16x324xf32>
    %93 = arith.addf %86, %92 : vector<16x324xf32>
    %c3_48 = arith.constant 3 : index
    %c0_49 = arith.constant 0 : index
    %c0_50 = arith.constant 0 : index
    %94 = vector.load %arg5[%c3_48, %c0_49, %c0_50] : memref<9x16x16xbf16, #tpu.memory_space<vmem>>, vector<1x16x16xbf16>
    %95 = vector.shape_cast %94 : vector<1x16x16xbf16> to vector<16x16xbf16>
    %96 = vector.extract_strided_slice %73 {offsets = [0, 323], sizes = [16, 1], strides = [1, 1]} : vector<16x324xbf16> to vector<16x1xbf16>
    %97 = vector.extract_strided_slice %73 {offsets = [0, 0], sizes = [16, 323], strides = [1, 1]} : vector<16x324xbf16> to vector<16x323xbf16>
    %98 = tpu.concatenate %96, %97 in 1 : vector<16x1xbf16>, vector<16x323xbf16> -> vector<16x324xbf16>
    %cst_51 = arith.constant dense<0.000000e+00> : vector<16x324xf32>
    %99 = tpu.matmul %95, %98, %cst_51 {dimension_numbers = #tpu.dot_dimension_numbers<[1], [0], [0], [1], [0, 0, 1, 1], [], []>} : vector<16x16xbf16>, vector<16x324xbf16>, vector<16x324xf32> -> vector<16x324xf32>
    %100 = arith.addf %93, %99 : vector<16x324xf32>
    %c4_52 = arith.constant 4 : index
    %c0_53 = arith.constant 0 : index
    %c0_54 = arith.constant 0 : index
    %101 = vector.load %arg5[%c4_52, %c0_53, %c0_54] : memref<9x16x16xbf16, #tpu.memory_space<vmem>>, vector<1x16x16xbf16>
    %102 = vector.shape_cast %101 : vector<1x16x16xbf16> to vector<16x16xbf16>
    %cst_55 = arith.constant dense<0.000000e+00> : vector<16x324xf32>
    %103 = tpu.matmul %102, %73, %cst_55 {dimension_numbers = #tpu.dot_dimension_numbers<[1], [0], [0], [1], [0, 0, 1, 1], [], []>} : vector<16x16xbf16>, vector<16x324xbf16>, vector<16x324xf32> -> vector<16x324xf32>
    %104 = arith.addf %100, %103 : vector<16x324xf32>
    %c5_56 = arith.constant 5 : index
    %c0_57 = arith.constant 0 : index
    %c0_58 = arith.constant 0 : index
    %105 = vector.load %arg5[%c5_56, %c0_57, %c0_58] : memref<9x16x16xbf16, #tpu.memory_space<vmem>>, vector<1x16x16xbf16>
    %106 = vector.shape_cast %105 : vector<1x16x16xbf16> to vector<16x16xbf16>
    %107 = vector.extract_strided_slice %73 {offsets = [0, 1], sizes = [16, 323], strides = [1, 1]} : vector<16x324xbf16> to vector<16x323xbf16>
    %108 = vector.extract_strided_slice %73 {offsets = [0, 0], sizes = [16, 1], strides = [1, 1]} : vector<16x324xbf16> to vector<16x1xbf16>
    %109 = tpu.concatenate %107, %108 in 1 : vector<16x323xbf16>, vector<16x1xbf16> -> vector<16x324xbf16>
    %cst_59 = arith.constant dense<0.000000e+00> : vector<16x324xf32>
    %110 = tpu.matmul %106, %109, %cst_59 {dimension_numbers = #tpu.dot_dimension_numbers<[1], [0], [0], [1], [0, 0, 1, 1], [], []>} : vector<16x16xbf16>, vector<16x324xbf16>, vector<16x324xf32> -> vector<16x324xf32>
    %111 = arith.addf %104, %110 : vector<16x324xf32>
    %c6_60 = arith.constant 6 : index
    %c0_61 = arith.constant 0 : index
    %c0_62 = arith.constant 0 : index
    %112 = vector.load %arg5[%c6_60, %c0_61, %c0_62] : memref<9x16x16xbf16, #tpu.memory_space<vmem>>, vector<1x16x16xbf16>
    %113 = vector.shape_cast %112 : vector<1x16x16xbf16> to vector<16x16xbf16>
    %114 = vector.extract_strided_slice %73 {offsets = [0, 17], sizes = [16, 307], strides = [1, 1]} : vector<16x324xbf16> to vector<16x307xbf16>
    %115 = vector.extract_strided_slice %73 {offsets = [0, 0], sizes = [16, 17], strides = [1, 1]} : vector<16x324xbf16> to vector<16x17xbf16>
    %116 = tpu.concatenate %114, %115 in 1 : vector<16x307xbf16>, vector<16x17xbf16> -> vector<16x324xbf16>
    %cst_63 = arith.constant dense<0.000000e+00> : vector<16x324xf32>
    %117 = tpu.matmul %113, %116, %cst_63 {dimension_numbers = #tpu.dot_dimension_numbers<[1], [0], [0], [1], [0, 0, 1, 1], [], []>} : vector<16x16xbf16>, vector<16x324xbf16>, vector<16x324xf32> -> vector<16x324xf32>
    %118 = arith.addf %111, %117 : vector<16x324xf32>
    %c7_64 = arith.constant 7 : index
    %c0_65 = arith.constant 0 : index
    %c0_66 = arith.constant 0 : index
    %119 = vector.load %arg5[%c7_64, %c0_65, %c0_66] : memref<9x16x16xbf16, #tpu.memory_space<vmem>>, vector<1x16x16xbf16>
    %120 = vector.shape_cast %119 : vector<1x16x16xbf16> to vector<16x16xbf16>
    %121 = vector.extract_strided_slice %73 {offsets = [0, 18], sizes = [16, 306], strides = [1, 1]} : vector<16x324xbf16> to vector<16x306xbf16>
    %122 = vector.extract_strided_slice %73 {offsets = [0, 0], sizes = [16, 18], strides = [1, 1]} : vector<16x324xbf16> to vector<16x18xbf16>
    %123 = tpu.concatenate %121, %122 in 1 : vector<16x306xbf16>, vector<16x18xbf16> -> vector<16x324xbf16>
    %cst_67 = arith.constant dense<0.000000e+00> : vector<16x324xf32>
    %124 = tpu.matmul %120, %123, %cst_67 {dimension_numbers = #tpu.dot_dimension_numbers<[1], [0], [0], [1], [0, 0, 1, 1], [], []>} : vector<16x16xbf16>, vector<16x324xbf16>, vector<16x324xf32> -> vector<16x324xf32>
    %125 = arith.addf %118, %124 : vector<16x324xf32>
    %c8_68 = arith.constant 8 : index
    %c0_69 = arith.constant 0 : index
    %c0_70 = arith.constant 0 : index
    %126 = vector.load %arg5[%c8_68, %c0_69, %c0_70] : memref<9x16x16xbf16, #tpu.memory_space<vmem>>, vector<1x16x16xbf16>
    %127 = vector.shape_cast %126 : vector<1x16x16xbf16> to vector<16x16xbf16>
    %128 = vector.extract_strided_slice %73 {offsets = [0, 19], sizes = [16, 305], strides = [1, 1]} : vector<16x324xbf16> to vector<16x305xbf16>
    %129 = vector.extract_strided_slice %73 {offsets = [0, 0], sizes = [16, 19], strides = [1, 1]} : vector<16x324xbf16> to vector<16x19xbf16>
    %130 = tpu.concatenate %128, %129 in 1 : vector<16x305xbf16>, vector<16x19xbf16> -> vector<16x324xbf16>
    %cst_71 = arith.constant dense<0.000000e+00> : vector<16x324xf32>
    %131 = tpu.matmul %127, %130, %cst_71 {dimension_numbers = #tpu.dot_dimension_numbers<[1], [0], [0], [1], [0, 0, 1, 1], [], []>} : vector<16x16xbf16>, vector<16x324xbf16>, vector<16x324xf32> -> vector<16x324xf32>
    %132 = arith.addf %125, %131 : vector<16x324xf32>
    %c0_72 = arith.constant 0 : index
    %c0_73 = arith.constant 0 : index
    %133 = vector.load %arg6[%c0_72, %c0_73] : memref<16x1xf32, #tpu.memory_space<vmem>>, vector<16x1xf32>
    %134 = vector.broadcast %133 : vector<16x1xf32> to vector<16x324xf32>
    %135 = arith.mulf %132, %134 : vector<16x324xf32>
    %c0_74 = arith.constant 0 : index
    %c0_75 = arith.constant 0 : index
    %136 = vector.load %arg7[%c0_74, %c0_75] : memref<16x1xf32, #tpu.memory_space<vmem>>, vector<16x1xf32>
    %137 = vector.broadcast %136 : vector<16x1xf32> to vector<16x324xf32>
    %138 = arith.addf %135, %137 : vector<16x324xf32>
    %cst_76 = arith.constant 0.000000e+00 : f32
    %139 = vector.broadcast %cst_76 : f32 to vector<16x324xf32>
    %140 = arith.maximumf %138, %139 : vector<16x324xf32>
    %141 = vector.broadcast %0 : vector<1x324xf32> to vector<16x324xf32>
    %142 = arith.mulf %140, %141 : vector<16x324xf32>
    %143 = arith.truncf %142 : vector<16x324xf32> to vector<16x324xbf16>
    %c0_77 = arith.constant 0 : index
    %c0_78 = arith.constant 0 : index
    %c0_79 = arith.constant 0 : index
    %144 = vector.load %arg8[%c0_77, %c0_78, %c0_79] : memref<9x32x16xbf16, #tpu.memory_space<vmem>>, vector<1x32x16xbf16>
    %145 = vector.shape_cast %144 : vector<1x32x16xbf16> to vector<32x16xbf16>
    %146 = vector.extract_strided_slice %143 {offsets = [0, 305], sizes = [16, 19], strides = [1, 1]} : vector<16x324xbf16> to vector<16x19xbf16>
    %147 = vector.extract_strided_slice %143 {offsets = [0, 0], sizes = [16, 305], strides = [1, 1]} : vector<16x324xbf16> to vector<16x305xbf16>
    %148 = tpu.concatenate %146, %147 in 1 : vector<16x19xbf16>, vector<16x305xbf16> -> vector<16x324xbf16>
    %cst_80 = arith.constant dense<0.000000e+00> : vector<32x324xf32>
    %149 = tpu.matmul %145, %148, %cst_80 {dimension_numbers = #tpu.dot_dimension_numbers<[1], [0], [0], [1], [0, 0, 1, 1], [], []>} : vector<32x16xbf16>, vector<16x324xbf16>, vector<32x324xf32> -> vector<32x324xf32>
    %c1_81 = arith.constant 1 : index
    %c0_82 = arith.constant 0 : index
    %c0_83 = arith.constant 0 : index
    %150 = vector.load %arg8[%c1_81, %c0_82, %c0_83] : memref<9x32x16xbf16, #tpu.memory_space<vmem>>, vector<1x32x16xbf16>
    %151 = vector.shape_cast %150 : vector<1x32x16xbf16> to vector<32x16xbf16>
    %152 = vector.extract_strided_slice %143 {offsets = [0, 306], sizes = [16, 18], strides = [1, 1]} : vector<16x324xbf16> to vector<16x18xbf16>
    %153 = vector.extract_strided_slice %143 {offsets = [0, 0], sizes = [16, 306], strides = [1, 1]} : vector<16x324xbf16> to vector<16x306xbf16>
    %154 = tpu.concatenate %152, %153 in 1 : vector<16x18xbf16>, vector<16x306xbf16> -> vector<16x324xbf16>
    %cst_84 = arith.constant dense<0.000000e+00> : vector<32x324xf32>
    %155 = tpu.matmul %151, %154, %cst_84 {dimension_numbers = #tpu.dot_dimension_numbers<[1], [0], [0], [1], [0, 0, 1, 1], [], []>} : vector<32x16xbf16>, vector<16x324xbf16>, vector<32x324xf32> -> vector<32x324xf32>
    %156 = arith.addf %149, %155 : vector<32x324xf32>
    %c2_85 = arith.constant 2 : index
    %c0_86 = arith.constant 0 : index
    %c0_87 = arith.constant 0 : index
    %157 = vector.load %arg8[%c2_85, %c0_86, %c0_87] : memref<9x32x16xbf16, #tpu.memory_space<vmem>>, vector<1x32x16xbf16>
    %158 = vector.shape_cast %157 : vector<1x32x16xbf16> to vector<32x16xbf16>
    %159 = vector.extract_strided_slice %143 {offsets = [0, 307], sizes = [16, 17], strides = [1, 1]} : vector<16x324xbf16> to vector<16x17xbf16>
    %160 = vector.extract_strided_slice %143 {offsets = [0, 0], sizes = [16, 307], strides = [1, 1]} : vector<16x324xbf16> to vector<16x307xbf16>
    %161 = tpu.concatenate %159, %160 in 1 : vector<16x17xbf16>, vector<16x307xbf16> -> vector<16x324xbf16>
    %cst_88 = arith.constant dense<0.000000e+00> : vector<32x324xf32>
    %162 = tpu.matmul %158, %161, %cst_88 {dimension_numbers = #tpu.dot_dimension_numbers<[1], [0], [0], [1], [0, 0, 1, 1], [], []>} : vector<32x16xbf16>, vector<16x324xbf16>, vector<32x324xf32> -> vector<32x324xf32>
    %163 = arith.addf %156, %162 : vector<32x324xf32>
    %c3_89 = arith.constant 3 : index
    %c0_90 = arith.constant 0 : index
    %c0_91 = arith.constant 0 : index
    %164 = vector.load %arg8[%c3_89, %c0_90, %c0_91] : memref<9x32x16xbf16, #tpu.memory_space<vmem>>, vector<1x32x16xbf16>
    %165 = vector.shape_cast %164 : vector<1x32x16xbf16> to vector<32x16xbf16>
    %166 = vector.extract_strided_slice %143 {offsets = [0, 323], sizes = [16, 1], strides = [1, 1]} : vector<16x324xbf16> to vector<16x1xbf16>
    %167 = vector.extract_strided_slice %143 {offsets = [0, 0], sizes = [16, 323], strides = [1, 1]} : vector<16x324xbf16> to vector<16x323xbf16>
    %168 = tpu.concatenate %166, %167 in 1 : vector<16x1xbf16>, vector<16x323xbf16> -> vector<16x324xbf16>
    %cst_92 = arith.constant dense<0.000000e+00> : vector<32x324xf32>
    %169 = tpu.matmul %165, %168, %cst_92 {dimension_numbers = #tpu.dot_dimension_numbers<[1], [0], [0], [1], [0, 0, 1, 1], [], []>} : vector<32x16xbf16>, vector<16x324xbf16>, vector<32x324xf32> -> vector<32x324xf32>
    %170 = arith.addf %163, %169 : vector<32x324xf32>
    %c4_93 = arith.constant 4 : index
    %c0_94 = arith.constant 0 : index
    %c0_95 = arith.constant 0 : index
    %171 = vector.load %arg8[%c4_93, %c0_94, %c0_95] : memref<9x32x16xbf16, #tpu.memory_space<vmem>>, vector<1x32x16xbf16>
    %172 = vector.shape_cast %171 : vector<1x32x16xbf16> to vector<32x16xbf16>
    %cst_96 = arith.constant dense<0.000000e+00> : vector<32x324xf32>
    %173 = tpu.matmul %172, %143, %cst_96 {dimension_numbers = #tpu.dot_dimension_numbers<[1], [0], [0], [1], [0, 0, 1, 1], [], []>} : vector<32x16xbf16>, vector<16x324xbf16>, vector<32x324xf32> -> vector<32x324xf32>
    %174 = arith.addf %170, %173 : vector<32x324xf32>
    %c5_97 = arith.constant 5 : index
    %c0_98 = arith.constant 0 : index
    %c0_99 = arith.constant 0 : index
    %175 = vector.load %arg8[%c5_97, %c0_98, %c0_99] : memref<9x32x16xbf16, #tpu.memory_space<vmem>>, vector<1x32x16xbf16>
    %176 = vector.shape_cast %175 : vector<1x32x16xbf16> to vector<32x16xbf16>
    %177 = vector.extract_strided_slice %143 {offsets = [0, 1], sizes = [16, 323], strides = [1, 1]} : vector<16x324xbf16> to vector<16x323xbf16>
    %178 = vector.extract_strided_slice %143 {offsets = [0, 0], sizes = [16, 1], strides = [1, 1]} : vector<16x324xbf16> to vector<16x1xbf16>
    %179 = tpu.concatenate %177, %178 in 1 : vector<16x323xbf16>, vector<16x1xbf16> -> vector<16x324xbf16>
    %cst_100 = arith.constant dense<0.000000e+00> : vector<32x324xf32>
    %180 = tpu.matmul %176, %179, %cst_100 {dimension_numbers = #tpu.dot_dimension_numbers<[1], [0], [0], [1], [0, 0, 1, 1], [], []>} : vector<32x16xbf16>, vector<16x324xbf16>, vector<32x324xf32> -> vector<32x324xf32>
    %181 = arith.addf %174, %180 : vector<32x324xf32>
    %c6_101 = arith.constant 6 : index
    %c0_102 = arith.constant 0 : index
    %c0_103 = arith.constant 0 : index
    %182 = vector.load %arg8[%c6_101, %c0_102, %c0_103] : memref<9x32x16xbf16, #tpu.memory_space<vmem>>, vector<1x32x16xbf16>
    %183 = vector.shape_cast %182 : vector<1x32x16xbf16> to vector<32x16xbf16>
    %184 = vector.extract_strided_slice %143 {offsets = [0, 17], sizes = [16, 307], strides = [1, 1]} : vector<16x324xbf16> to vector<16x307xbf16>
    %185 = vector.extract_strided_slice %143 {offsets = [0, 0], sizes = [16, 17], strides = [1, 1]} : vector<16x324xbf16> to vector<16x17xbf16>
    %186 = tpu.concatenate %184, %185 in 1 : vector<16x307xbf16>, vector<16x17xbf16> -> vector<16x324xbf16>
    %cst_104 = arith.constant dense<0.000000e+00> : vector<32x324xf32>
    %187 = tpu.matmul %183, %186, %cst_104 {dimension_numbers = #tpu.dot_dimension_numbers<[1], [0], [0], [1], [0, 0, 1, 1], [], []>} : vector<32x16xbf16>, vector<16x324xbf16>, vector<32x324xf32> -> vector<32x324xf32>
    %188 = arith.addf %181, %187 : vector<32x324xf32>
    %c7_105 = arith.constant 7 : index
    %c0_106 = arith.constant 0 : index
    %c0_107 = arith.constant 0 : index
    %189 = vector.load %arg8[%c7_105, %c0_106, %c0_107] : memref<9x32x16xbf16, #tpu.memory_space<vmem>>, vector<1x32x16xbf16>
    %190 = vector.shape_cast %189 : vector<1x32x16xbf16> to vector<32x16xbf16>
    %191 = vector.extract_strided_slice %143 {offsets = [0, 18], sizes = [16, 306], strides = [1, 1]} : vector<16x324xbf16> to vector<16x306xbf16>
    %192 = vector.extract_strided_slice %143 {offsets = [0, 0], sizes = [16, 18], strides = [1, 1]} : vector<16x324xbf16> to vector<16x18xbf16>
    %193 = tpu.concatenate %191, %192 in 1 : vector<16x306xbf16>, vector<16x18xbf16> -> vector<16x324xbf16>
    %cst_108 = arith.constant dense<0.000000e+00> : vector<32x324xf32>
    %194 = tpu.matmul %190, %193, %cst_108 {dimension_numbers = #tpu.dot_dimension_numbers<[1], [0], [0], [1], [0, 0, 1, 1], [], []>} : vector<32x16xbf16>, vector<16x324xbf16>, vector<32x324xf32> -> vector<32x324xf32>
    %195 = arith.addf %188, %194 : vector<32x324xf32>
    %c8_109 = arith.constant 8 : index
    %c0_110 = arith.constant 0 : index
    %c0_111 = arith.constant 0 : index
    %196 = vector.load %arg8[%c8_109, %c0_110, %c0_111] : memref<9x32x16xbf16, #tpu.memory_space<vmem>>, vector<1x32x16xbf16>
    %197 = vector.shape_cast %196 : vector<1x32x16xbf16> to vector<32x16xbf16>
    %198 = vector.extract_strided_slice %143 {offsets = [0, 19], sizes = [16, 305], strides = [1, 1]} : vector<16x324xbf16> to vector<16x305xbf16>
    %199 = vector.extract_strided_slice %143 {offsets = [0, 0], sizes = [16, 19], strides = [1, 1]} : vector<16x324xbf16> to vector<16x19xbf16>
    %200 = tpu.concatenate %198, %199 in 1 : vector<16x305xbf16>, vector<16x19xbf16> -> vector<16x324xbf16>
    %cst_112 = arith.constant dense<0.000000e+00> : vector<32x324xf32>
    %201 = tpu.matmul %197, %200, %cst_112 {dimension_numbers = #tpu.dot_dimension_numbers<[1], [0], [0], [1], [0, 0, 1, 1], [], []>} : vector<32x16xbf16>, vector<16x324xbf16>, vector<32x324xf32> -> vector<32x324xf32>
    %202 = arith.addf %195, %201 : vector<32x324xf32>
    %c0_113 = arith.constant 0 : index
    %c0_114 = arith.constant 0 : index
    %203 = vector.load %arg9[%c0_113, %c0_114] : memref<32x1xf32, #tpu.memory_space<vmem>>, vector<32x1xf32>
    %204 = vector.broadcast %203 : vector<32x1xf32> to vector<32x324xf32>
    %205 = arith.mulf %202, %204 : vector<32x324xf32>
    %c0_115 = arith.constant 0 : index
    %c0_116 = arith.constant 0 : index
    %206 = vector.load %arg10[%c0_115, %c0_116] : memref<32x1xf32, #tpu.memory_space<vmem>>, vector<32x1xf32>
    %207 = vector.broadcast %206 : vector<32x1xf32> to vector<32x324xf32>
    %208 = arith.addf %205, %207 : vector<32x324xf32>
    %cst_117 = arith.constant 0.000000e+00 : f32
    %209 = vector.broadcast %cst_117 : f32 to vector<32x324xf32>
    %210 = arith.maximumf %208, %209 : vector<32x324xf32>
    %211 = vector.broadcast %0 : vector<1x324xf32> to vector<32x324xf32>
    %212 = arith.mulf %210, %211 : vector<32x324xf32>
    %c0_118 = arith.constant 0 : index
    %c0_119 = arith.constant 0 : index
    %213 = vector.load %arg11[%c0_118, %c0_119] : memref<4x32xbf16, #tpu.memory_space<vmem>>, vector<4x32xbf16>
    %214 = arith.truncf %212 : vector<32x324xf32> to vector<32x324xbf16>
    %cst_120 = arith.constant dense<0.000000e+00> : vector<4x324xf32>
    %215 = tpu.matmul %213, %214, %cst_120 {dimension_numbers = #tpu.dot_dimension_numbers<[1], [0], [0], [1], [0, 0, 1, 1], [], []>} : vector<4x32xbf16>, vector<32x324xbf16>, vector<4x324xf32> -> vector<4x324xf32>
    %c0_121 = arith.constant 0 : index
    %c0_122 = arith.constant 0 : index
    %216 = vector.load %arg12[%c0_121, %c0_122] : memref<4x1xf32, #tpu.memory_space<vmem>>, vector<4x1xf32>
    %217 = vector.broadcast %216 : vector<4x1xf32> to vector<4x324xf32>
    %218 = arith.addf %215, %217 : vector<4x324xf32>
    %c0_123 = arith.constant 0 : index
    %c0_124 = arith.constant 0 : index
    %c0_125 = arith.constant 0 : index
    %219 = vector.load %arg14[%c0_123, %c0_124, %c0_125] : memref<1x32x324xf32, #tpu.memory_space<vmem>>, vector<1x32x324xf32>
    %220 = vector.shape_cast %219 : vector<1x32x324xf32> to vector<32x324xf32>
    %221 = vector.shape_cast %212 : vector<32x324xf32> to vector<1x32x324xf32>
    tpu.vector_store %arg14[%c0_123, %c0_124, %c0_125], %221 {strides = array<i32>} : memref<1x32x324xf32, #tpu.memory_space<vmem>>, vector<1x32x324xf32>,
    %c0_126 = arith.constant 0 : index
    %c0_127 = arith.constant 0 : index
    %c0_128 = arith.constant 0 : index
    %222 = vector.load %arg15[%c0_126, %c0_127, %c0_128] : memref<1x4x324xf32, #tpu.memory_space<vmem>>, vector<1x4x324xf32>
    %223 = vector.shape_cast %222 : vector<1x4x324xf32> to vector<4x324xf32>
    %224 = vector.shape_cast %218 : vector<4x324xf32> to vector<1x4x324xf32>
    tpu.vector_store %arg15[%c0_126, %c0_127, %c0_128], %224 {strides = array<i32>} : memref<1x4x324xf32, #tpu.memory_space<vmem>>, vector<1x4x324xf32>,
    return
  }
  func.func @transform_0(%arg0: i32) -> (i32, i32, i32) {
    %c0_i32 = arith.constant 0 : i32
    %c0_i32_0 = arith.constant 0 : i32
    %c0_i32_1 = arith.constant 0 : i32
    return %arg0, %c0_i32, %c0_i32_0 : i32, i32, i32
  }
  func.func @transform_1(%arg0: i32) -> (i32, i32, i32) {
    %c0_i32 = arith.constant 0 : i32
    %c0_i32_0 = arith.constant 0 : i32
    %c0_i32_1 = arith.constant 0 : i32
    %c0_i32_2 = arith.constant 0 : i32
    return %c0_i32, %c0_i32_0, %c0_i32_1 : i32, i32, i32
  }
  func.func @transform_2(%arg0: i32) -> (i32, i32) {
    %c0_i32 = arith.constant 0 : i32
    %c0_i32_0 = arith.constant 0 : i32
    %c0_i32_1 = arith.constant 0 : i32
    return %c0_i32, %c0_i32_0 : i32, i32
  }
  func.func @transform_3(%arg0: i32) -> (i32, i32) {
    %c0_i32 = arith.constant 0 : i32
    %c0_i32_0 = arith.constant 0 : i32
    %c0_i32_1 = arith.constant 0 : i32
    return %c0_i32, %c0_i32_0 : i32, i32
  }
  func.func @transform_4(%arg0: i32) -> (i32, i32, i32) {
    %c0_i32 = arith.constant 0 : i32
    %c0_i32_0 = arith.constant 0 : i32
    %c0_i32_1 = arith.constant 0 : i32
    %c0_i32_2 = arith.constant 0 : i32
    return %c0_i32, %c0_i32_0, %c0_i32_1 : i32, i32, i32
  }
  func.func @transform_5(%arg0: i32) -> (i32, i32) {
    %c0_i32 = arith.constant 0 : i32
    %c0_i32_0 = arith.constant 0 : i32
    %c0_i32_1 = arith.constant 0 : i32
    return %c0_i32, %c0_i32_0 : i32, i32
  }
  func.func @transform_6(%arg0: i32) -> (i32, i32) {
    %c0_i32 = arith.constant 0 : i32
    %c0_i32_0 = arith.constant 0 : i32
    %c0_i32_1 = arith.constant 0 : i32
    return %c0_i32, %c0_i32_0 : i32, i32
  }
  func.func @transform_7(%arg0: i32) -> (i32, i32, i32) {
    %c0_i32 = arith.constant 0 : i32
    %c0_i32_0 = arith.constant 0 : i32
    %c0_i32_1 = arith.constant 0 : i32
    %c0_i32_2 = arith.constant 0 : i32
    return %c0_i32, %c0_i32_0, %c0_i32_1 : i32, i32, i32
  }
  func.func @transform_8(%arg0: i32) -> (i32, i32) {
    %c0_i32 = arith.constant 0 : i32
    %c0_i32_0 = arith.constant 0 : i32
    %c0_i32_1 = arith.constant 0 : i32
    return %c0_i32, %c0_i32_0 : i32, i32
  }
  func.func @transform_9(%arg0: i32) -> (i32, i32) {
    %c0_i32 = arith.constant 0 : i32
    %c0_i32_0 = arith.constant 0 : i32
    %c0_i32_1 = arith.constant 0 : i32
    return %c0_i32, %c0_i32_0 : i32, i32
  }
  func.func @transform_10(%arg0: i32) -> (i32, i32) {
    %c0_i32 = arith.constant 0 : i32
    %c0_i32_0 = arith.constant 0 : i32
    %c0_i32_1 = arith.constant 0 : i32
    return %c0_i32, %c0_i32_0 : i32, i32
  }
  func.func @transform_11(%arg0: i32) -> (i32, i32) {
    %c0_i32 = arith.constant 0 : i32
    %c0_i32_0 = arith.constant 0 : i32
    %c0_i32_1 = arith.constant 0 : i32
    return %c0_i32, %c0_i32_0 : i32, i32
  }
  func.func @transform_12(%arg0: i32) -> (i32, i32) {
    %c0_i32 = arith.constant 0 : i32
    %c0_i32_0 = arith.constant 0 : i32
    %c0_i32_1 = arith.constant 0 : i32
    return %c0_i32, %c0_i32_0 : i32, i32
  }
  func.func @transform_13(%arg0: i32) -> (i32, i32, i32) {
    %c0_i32 = arith.constant 0 : i32
    %c0_i32_0 = arith.constant 0 : i32
    %c0_i32_1 = arith.constant 0 : i32
    return %arg0, %c0_i32, %c0_i32_0 : i32, i32, i32
  }
  func.func @transform_14(%arg0: i32) -> (i32, i32, i32) {
    %c0_i32 = arith.constant 0 : i32
    %c0_i32_0 = arith.constant 0 : i32
    %c0_i32_1 = arith.constant 0 : i32
    return %arg0, %c0_i32, %c0_i32_0 : i32, i32, i32
  }
}

</mosaic_0001>

<bundles_post_ra>
// kernel: mfnet_baseline_forward.1
= control target key start
LH: loop header
LB: loop body
LE: loop exit
PB: predicated region body
PF: predicated region fallthrough
CT: control target
= control target key end

     0   :  { %s5177_s29 = smov 0   ;;  %s5910_s0 = inlined_call_operand.vmem [shape: f32[2,4,324], index: 0, kind: input, shape index: {}]   ;;  %s5911_s1 = inlined_call_operand.vmem [shape: bf16[9,16,4], index: 1, kind: input, shape index: {}]   ;;  %s5912_s2 = inlined_call_operand.vmem [shape: f32[16,1], index: 2, kind: input, shape index: {}]   ;;  %s5913_s3 = inlined_call_operand.vmem [shape: f32[16,1], index: 3, kind: input, shape index: {}]   ;;  %s5914_s4 = inlined_call_operand.vmem [shape: bf16[9,16,16], index: 4, kind: input, shape index: {}]   ;;  %s5915_s5 = inlined_call_operand.vmem [shape: f32[16,1], index: 5, kind: input, shape index: {}]   ;;  %s5916_s6 = inlined_call_operand.vmem [shape: f32[16,1], index: 6, kind: input, shape index: {}]   ;;  %s5917_s7 = inlined_call_operand.vmem [shape: bf16[9,32,16], index: 7, kind: input, shape index: {}]   ;;  %s5918_s8 = inlined_call_operand.vmem [shape: f32[32,1], index: 8, kind: input, shape index: {}]   ;;  %s5919_s9 = inlined_call_operand.vmem [shape: f32[32,1], index: 9, kind: input, shape index: {}]   ;;  %s5920_s10 = inlined_call_operand.vmem [shape: bf16[4,32], index: 10, kind: input, shape index: {}]   ;;  %s5921_s11 = inlined_call_operand.vmem [shape: f32[4,1], index: 11, kind: input, shape index: {}]   ;;  %s5922_s12 = inlined_call_operand.vmem [shape: f32[1,324], index: 12, kind: input, shape index: {}]   ;;  %s5923_s13 = inlined_call_operand.vmem [shape: f32[2,32,324], index: 13, kind: output, shape index: {0}]   ;;  %s5924_s14 = inlined_call_operand.vmem [shape: f32[2,4,324], index: 14, kind: output, shape index: {1}]  }
   0x1   :  { %5954 = sst [smem:[#allocation2_spill]] %s5910_s0 }
   0x2   :  { %5955 = sst [smem:[#allocation3_spill]] %s5911_s1 }
   0x3   :  { %5956 = sst [smem:[#allocation4_spill]] %s5912_s2 }
   0x4   :  { %5957 = sst [smem:[#allocation5_spill]] %s5913_s3 }
   0x5   :  { %5958 = sst [smem:[#allocation6_spill]] %s5922_s12 }
   0x6 LB: > { %s4354_s30 = sadd.s32 4294967295, %s5081_s29   ;;  %p4358_p0 = scmp.ge.s32.totalorder %s5081_s29, 1  ;;  %s5081_s29 = sphi %s5177_s29, %s25_s29  }
   0x7   : > { %p415_p1 = scmp.lt.s32.totalorder %s5081_s29, 3 }
   0x9   : > { %p416_p2 = pnand %p4358_p0, %p415_p1 }
   0xa   : > { %p466_p3 = scmp.lt.s32.totalorder (!%p416_p2), %s4354_s30, 1  ;;  %v5083_v0 = vmov (!%p416_p2), 0   ;;  %s5959_s0 = sld [smem:[#allocation2_spill]] (!%p416_p2)  ;;  %vm522_vm0 = vcmask (!%p416_p2), 146432   ;;  %vm538_vm1 = vcmask (!%p416_p2), 1041408   ;;  %vm534_vm2 = vcmask (!%p416_p2), 31744  }
   0xb   : > { %419 = sbr.rel (%p416_p2) target bundleno = 1615 (0x64f), region = 72  ;;  %579 = vmatprep.mubr.bf16.mxu1 (!%p416_p2), %v5083_v0  ;;  %679 = vmatprep.mubr.bf16.mxu0 (!%p416_p2), %v5083_v0  ;;  %s5946_s19 = smov (!%p416_p2), 78   ;;  %v5100_v21 = vmov (!%p416_p2), 0.0   ;;  %vm504_vm3 = vcmask (!%p416_p2), 154624   ;;  %vm5101_vm4 = vmmov (!%p416_p2), 0   ;;  %vm742_vm5 = vcmask (!%p416_p2), 138240  }
   0xc   : > { %5037 = vset.pattern.permute.xlu1 (!%p416_p2), %v5083_v0  ;;  %5036 = vset.pattern.permute.xlu0 (!%p416_p2), %v5083_v0  ;;  %s5949_s20 = smov (!%p416_p2), 18   ;;  %s5951_s21 = smov (!%p416_p2), 79   ;;  %vm866_vm6 = vcmask (!%p416_p2), 7168   ;;  %vm1098_vm7 = vcmask (!%p416_p2), 1039360   ;;  %vm1222_vm8 = vcmask (!%p416_p2), 908288   ;;  %vm1103_vm9 = vcmask (!%p416_p2), 547840  }
   0xd   : > { %s5952_s22 = smov (!%p416_p2), 19   ;;  %s5942_s23 = smov (!%p416_p2), 77   ;;  %vm1346_vm10 = vcmask (!%p416_p2), 900096   ;;  %vm1227_vm11 = vcmask (!%p416_p2), 416768   ;;  %vm1470_vm12 = vcmask (!%p416_p2), 891904   ;;  %vm1351_vm13 = vcmask (!%p416_p2), 408576  }
   0xe   : > { %s5947_s24 = smov (!%p416_p2), 17   ;;  %s5938_s25 = smov (!%p416_p2), 61   ;;  %vm1475_vm14 = vcmask (!%p416_p2), 400384   ;;  %vm1697_vm15 = vcmask (!%p416_p2), 130048  }
   0xf   : > { %s5940_s26 = smov (!%p416_p2), 1   ;;  %s5934_s27 = smov (!%p416_p2), 127  }
  0x10   : > { %s5926_s28 = smov (!%p416_p2), 67   ;;  %s5930_s16 = smov (!%p416_p2), 111  }
  0x11   : > { %s5928_s17 = smov (!%p416_p2), 51   ;;  %s5960_s2 = sld [smem:[#allocation4_spill]] (!%p416_p2) }
  0x12   : > { %s5981_s30 = smov (!%p466_p3, %s4354_s30), 1  ;;  %s5961_s3 = sld [smem:[#allocation5_spill]] }
  0x13   : > { %s5925_s15 = smul.u32 12, %s5981_s30  ;;  %s5962_s1 = sld [smem:[#allocation3_spill]] }
  0x14   : > { %s5963_s12 = sld [smem:[#allocation6_spill]] }
  0x15   : > { %s470_s18 = scalar_lea.vmem %s5959_s0, %s5925_s15  ;;  %s5936_s15 = smov 50  }
  0x16   : > { %v484_v1 = vld [vmem:[%s470_s18 + $0x8] sm:$0xf]  ;;  %v483_v2 = vld [vmem:[%s470_s18] sm:$0xff]  ;;  %s5932_s18 = smov 110  }
  0x17   : > { %v5197_v3 = vpack.c.bf16 %v484_v1, %v484_v1  ;;  %v486_v4 = vcombine.high %v483_v2, %v483_v2  ;;  %v5201_v5 = vpack.c.bf16 %v483_v2, %v483_v2  ;;  %v1586_v7 = vld [vmem:[%s5960_s2 + $0x8] sm:$0xff]  ;;  %v1585_v8 = vld [vmem:[%s5960_s2] sm:$0xff]  ;;  %s5974_s2 = smov 19  }
  0x18   : > { %v1603_v9 = vld [vmem:[%s5961_s3] sm:$0xff]  ;;  %v1604_v10 = vld [vmem:[%s5961_s3 + $0x8] sm:$0xff]  ;;  %s5975_s3 = smov 79  }
  0x19   : > { %514 = vrot.lane.b32.xlu0 %v5197_v3, %s5946_s19  ;;  %v5203_v6 = vpack.c.bf16 %v486_v4, %v486_v4  ;;  %v5039_v18 = vld [vmem:[%s5962_s1 + $0x8] sm:$0xff]   ;;  %v5040_v28 = vld [vmem:[%s5962_s1] sm:$0xff]   ;;  %v5041_v41 = vld [vmem:[%s5962_s1 + $0x10] sm:$0xff]   ;;  %v991_v55 = vsel %vm538_vm1, %v5201_v5, 0  ;;  %v997_v1 = vsel %vm538_vm1, %v5197_v3, 0 }
  0x1a   : > { %v5042_v51 = vld [vmem:[%s5962_s1 + $0x18] sm:$0xff]   ;;  %v5043_v60 = vld [vmem:[%s5962_s1 + $0x20] sm:$0xff]  }
  0x1b   : > { %518 = vrot.lane.b32.xlu1 %v5203_v6, %s5949_s20 }
  0x1d   : > { %516 = vrot.lane.b32.xlu0 %v5201_v5, %s5949_s20 }
  0x1f   : > { %520 = vrot.lane.b32.xlu1 %v5197_v3, %s5949_s20 }
  0x21   : > { %494 = vrot.lane.b32.xlu0 %v5197_v3, %s5951_s21 }
  0x23   : > { %498 = vrot.lane.b32.xlu1 %v5201_v5, %s5952_s22 }
  0x25   : > { %500 = vrot.lane.b32.xlu0 %v5203_v6, %s5952_s22 }
  0x27   : > { %502 = vrot.lane.b32.xlu1 %v5197_v3, %s5952_s22 }
  0x29   : > { %734 = vrot.lane.b32.xlu0 %v5197_v3, %s5942_s23  ;;  %s5970_s23 = smov 51  }
  0x2b   : > { %736 = vrot.lane.b32.xlu1 %v5201_v5, %s5947_s24 }
  0x2d   : > { %738 = vrot.lane.b32.xlu0 %v5203_v6, %s5947_s24 }
  0x2f   : > { %740 = vrot.lane.b32.xlu1 %v5197_v3, %s5947_s24 }
  0x31   : > { %858 = vrot.lane.b32.xlu0 %v5197_v3, %s5938_s25  ;;  %s5969_s25 = smov 111  }
  0x33   : > { %860 = vrot.lane.b32.xlu1 %v5201_v5, %s5940_s26 }
  0x35   : > { %862 = vrot.lane.b32.xlu0 %v5203_v6, %s5940_s26 }
  0x37   : > { %864 = vrot.lane.b32.xlu1 %v5197_v3, %s5940_s26  ;;  %s5971_s26 = smov 110  }
  0x39   : > { %1092 = vrot.lane.b32.xlu0 %v5201_v5, %s5934_s27 }
  0x3b   : > { %1094 = vrot.lane.b32.xlu1 %v5203_v6, %s5934_s27 }
  0x3d   : > { %1096 = vrot.lane.b32.xlu0 %v5197_v3, %s5934_s27  ;;  %s5964_s27 = smov 77  }
  0x3f   : > { %1101 = vrot.lane.b32.xlu1 %v5201_v5, %s5926_s28  ;;  %s5944_s28 = smov 109  }
  0x41   : > { %1216 = vrot.lane.b32.xlu0 %v5201_v5, %s5930_s16 }
  0x43   : > { %1218 = vrot.lane.b32.xlu1 %v5203_v6, %s5930_s16 }
  0x45   : > { %1220 = vrot.lane.b32.xlu0 %v5197_v3, %s5930_s16  ;;  %s5966_s16 = smov 61  }
  0x47   : > { %1225 = vrot.lane.b32.xlu1 %v5201_v5, %s5928_s17  ;;  %s5099_s17 = smov 49  }
  0x49   : > { %1340 = vrot.lane.b32.xlu0 %v5201_v5, %s5932_s18 }
  0x4b   : > { %1342 = vrot.lane.b32.xlu1 %v5203_v6, %s5932_s18 }
  0x4d   : > { %1344 = vrot.lane.b32.xlu0 %v5197_v3, %s5932_s18  ;;  %s5967_s18 = smov 127  }
  0x4f   : > { %1349 = vrot.lane.b32.xlu1 %v5201_v5, %s5936_s15  ;;  %s5968_s15 = smov 67  }
  0x51   : > { %1464 = vrot.lane.b32.xlu0 %v5201_v5, %s5944_s28 }
  0x53   : > { %1466 = vrot.lane.b32.xlu1 %v5203_v6, %s5944_s28 }
  0x55   : > { %1468 = vrot.lane.b32.xlu0 %v5197_v3, %s5944_s28  ;;  %s5965_s28 = smov 1  }
  0x57   : > { %1473 = vrot.lane.b32.xlu1 %v5201_v5, %s5099_s17 }
  0x59   : > { %1589 = vperm.xlu0 %5036, %v1585_v8  }
  0x5b   : > { %1594 = vperm.xlu1 %5037, %v1586_v7   ;;  %v5044_v7 = vld [vmem:[%s5962_s1 + $0x28] sm:$0xff]  }
  0x5d   : > { %1612 = vperm.xlu0 %5036, %v1604_v10  }
  0x5f   : > { %1607 = vperm.xlu1 %5037, %v1603_v9  }
  0x8b   : > { %v515_v11 = vpop.permute.xlu0 %514 }
  0x8d   : > { %v519_v12 = vpop.permute.xlu1 %518 }
  0x8f   : > { %v517_v13 = vpop.permute.xlu0 %516 }
  0x90   : > { %v523_v14 = vsel %vm522_vm0, %v517_v13, %v519_v12  ;;  %v528_v15 = vsel %vm522_vm0, %v515_v11, %v517_v13 }
  0x91   : > { %4365 = vmatprep.subr.msk.bf16.mxu1 %vm538_vm1, %v523_v14  ;;  %v521_v16 = vpop.permute.xlu1 %520  ;;  %v539_v17 = vsel %vm538_vm1, %v528_v15, 0 }
  0x92   : > { %v524_v19 = vsel %vm522_vm0, %v519_v12, %v521_v16  ;;  %548 = vmatpush1.bf16.msra.mxu1 %v539_v17  ;;  %v5045_v17 = vld [vmem:[%s5962_s1 + $0x30] sm:$0xff]  }
  0x93   : > { %v495_v20 = vpop.permute.xlu0 %494  ;;  %4613 = vmatprep.subr.bf16.mxu1 %v5100_v21  ;;  %v545_v22 = vsel %vm538_vm1, %v524_v19, 0 }
  0x95   : > { %4366 = vmatmul.mubr.msk.bf16.vlgmr.msra.gmra.mrb[0].mxu1 %vm534_vm2, %v5039_v18  ;;  %v499_v23 = vpop.permute.xlu1 %498 }
  0x96   : > { %4614 = vmatpush3.bf16.msra.mxu1 %v545_v22  ;;  %v510_v24 = vsel %vm504_vm3, %v495_v20, %v499_v23  ;;  %4615 = vmatprep.mubr.msk.bf16.mxu1 %vm5101_vm4, %v5100_v21 }
  0x97   : > { %v501_v25 = vpop.permute.xlu0 %500  ;;  %v639_v26 = vsel %vm538_vm1, %v510_v24, 0  ;;  %4619 = vmatprep.subr.bf16.mxu1 %v5100_v21 }
  0x98   : > { %v505_v27 = vsel %vm504_vm3, %v499_v23, %v501_v25 }
  0x99   : > { %4369 = vmatprep.subr.msk.bf16.mxu0 %vm538_vm1, %v505_v27  ;;  %v503_v29 = vpop.permute.xlu1 %502 }
  0x9a   : > { %648 = vmatpush1.bf16.msra.mxu0 %v639_v26  ;;  %v506_v30 = vsel %vm504_vm3, %v501_v25, %v503_v29  ;;  %v5046_v26 = vld [vmem:[%s5962_s1 + $0x38] sm:$0xff]  }
  0x9b   : > { %v645_v31 = vsel %vm538_vm1, %v506_v30, 0  ;;  %v735_v32 = vpop.permute.xlu0 %734 }
  0x9d   : > { %4616 = vmatmul.mubr.msk.bf16.vlgmr.msra.gmra.mrb[4].mxu1 %vm534_vm2, %v5039_v18  ;;  %4370 = vmatmul.mubr.msk.bf16.vlgmr.msra.gmra.mrb[0].mxu0 %vm534_vm2, %v5040_v28  ;;  %v737_v33 = vpop.permute.xlu1 %736 }
  0x9e   : > { %4620 = vmatpush3.bf16.msra.mxu1 %v645_v31  ;;  %v748_v34 = vsel %vm742_vm5, %v735_v32, %v737_v33  ;;  %4621 = vmatprep.mubr.msk.bf16.mxu1 %vm5101_vm4, %v5100_v21  ;;  %v5047_v31 = vld [vmem:[%s5962_s1 + $0x40] sm:$0xff]  }
  0x9f   : > { %v739_v35 = vpop.permute.xlu0 %738  ;;  %v757_v36 = vsel %vm538_vm1, %v748_v34, 0  ;;  %797 = vmatprep.mubr.bf16.mxu0 %v5083_v0  ;;  %4625 = vmatprep.subr.bf16.mxu1 %v5100_v21 }
  0xa0   : > { %v743_v37 = vsel %vm742_vm5, %v737_v33, %v739_v35 }
  0xa1   : > { %4375 = vmatprep.subr.msk.bf16.mxu0 %vm538_vm1, %v743_v37  ;;  %v741_v38 = vpop.permute.xlu1 %740  ;;  %v1628_v37 = vlaneseq }
  0xa2   : > { %766 = vmatpush1.bf16.msra.mxu0 %v757_v36  ;;  %v744_v40 = vsel %vm742_vm5, %v739_v35, %v741_v38 }
  0xa3   : > { %v859_v39 = vpop.permute.xlu0 %858  ;;  %v763_v44 = vsel %vm538_vm1, %v744_v40, 0  ;;  %v1629_v40 = vshrl.u32 %v1628_v37, 7 }
  0xa5   : > { %v861_v42 = vpop.permute.xlu1 %860 }
  0xa6   : > { %v872_v43 = vsel %vm866_vm6, %v859_v39, %v861_v42 }
  0xa7   : > { %v863_v45 = vpop.permute.xlu0 %862  ;;  %v881_v47 = vsel %vm538_vm1, %v872_v43, 0 }
  0xa8   : > { %v867_v46 = vsel %vm866_vm6, %v861_v42, %v863_v45 }
  0xa9   : > { %4622 = vmatmul.mubr.msk.bf16.vlgmr.msra.gmra.mrb[4].mxu1 %vm534_vm2, %v5040_v28  ;;  %4376 = vmatmul.mubr.msk.bf16.vlgmr.msra.gmra.mrb[0].mxu0 %vm534_vm2, %v5041_v41  ;;  %v865_v49 = vpop.permute.xlu1 %864 }
  0xaa   : > { %4626 = vmatpush3.bf16.msra.mxu1 %v763_v44  ;;  %4381 = vmatprep.subr.msk.bf16.mxu0 %vm538_vm1, %v867_v46  ;;  %v868_v50 = vsel %vm866_vm6, %v863_v45, %v865_v49 }
  0xab   : > { %890 = vmatpush1.bf16.msra.mxu0 %v881_v47  ;;  %4627 = vmatprep.mubr.msk.bf16.mxu1 %vm5101_vm4, %v5100_v21  ;;  %v1093_v48 = vpop.permute.xlu0 %1092  ;;  %v887_v54 = vsel %vm538_vm1, %v868_v50, 0  ;;  %v1630_v50 = vsub.s32 0, %v1629_v40 }
  0xac   : > { %921 = vmatprep.mubr.bf16.mxu0 %v5083_v0  ;;  %4631 = vmatprep.subr.bf16.mxu1 %v5100_v21 }
  0xad   : > { %4387 = vmatprep.subr.msk.bf16.mxu0 %vm538_vm1, %v5203_v6  ;;  %v1095_v53 = vpop.permute.xlu1 %1094 }
  0xae   : > { %v1099_v59 = vsel %vm1098_vm7, %v1093_v48, %v1095_v53 }
  0xaf   : > { %v1097_v52 = vpop.permute.xlu0 %1096  ;;  %v1116_v63 = vsel %vm538_vm1, %v1099_v59, 0 }
  0xb0   : > { %v1100_v56 = vsel %vm1098_vm7, %v1095_v53, %v1097_v52  ;;  %v482_v53 = vld [vmem:[%s5963_s12] sm:$0x7]  ;;  %s5976_s12 = smov 18  }
  0xb1   : > { %v1102_v58 = vpop.permute.xlu1 %1101 }
  0xb2   : > { %v1106_v5 = vsel %vm1103_vm9, %v1097_v52, %v1102_v58 }
  0xb3   : > { %v1217_v57 = vpop.permute.xlu0 %1216  ;;  %v1121_v10 = vsel %vm538_vm1, %v1106_v5, 0 }
  0xb5   : > { %4628 = vmatmul.mubr.msk.bf16.vlgmr.msra.gmra.mrb[4].mxu1 %vm534_vm2, %v5041_v41  ;;  %4382 = vmatmul.mubr.msk.bf16.vlgmr.msra.gmra.mrb[0].mxu0 %vm534_vm2, %v5042_v51  ;;  %v1219_v62 = vpop.permute.xlu1 %1218 }
  0xb6   : > { %4632 = vmatpush3.bf16.msra.mxu1 %v887_v54  ;;  %1000 = vmatpush1.bf16.msra.mxu0 %v991_v55  ;;  %v1223_v6 = vsel %vm1222_vm8, %v1217_v57, %v1219_v62  ;;  %v1634_v54 = vsub.s32 1, %v1629_v40 }
  0xb7   : > { %4633 = vmatprep.mubr.msk.bf16.mxu1 %vm5101_vm4, %v5100_v21  ;;  %1031 = vmatprep.mubr.bf16.mxu0 %v5083_v0  ;;  %v1221_v61 = vpop.permute.xlu0 %1220  ;;  %v1240_v11 = vsel %vm538_vm1, %v1223_v6, 0 }
  0xb8   : > { %4637 = vmatprep.subr.bf16.mxu1 %v5100_v21  ;;  %4393 = vmatprep.subr.msk.bf16.mxu0 %vm538_vm1, %v1100_v56  ;;  %v1224_v2 = vsel %vm1222_vm8, %v1219_v62, %v1221_v61 }
  0xb9   : > { %v1226_v3 = vpop.permute.xlu1 %1225 }
  0xba   : > { %v1230_v15 = vsel %vm1227_vm11, %v1221_v61, %v1226_v3 }
  0xbb   : > { %v1341_v4 = vpop.permute.xlu0 %1340  ;;  %v1245_v20 = vsel %vm538_vm1, %v1230_v15, 0 }
  0xbd   : > { %v1343_v9 = vpop.permute.xlu1 %1342 }
  0xbe   : > { %v1347_v16 = vsel %vm1346_vm10, %v1341_v4, %v1343_v9 }
  0xbf   : > { %v1345_v8 = vpop.permute.xlu0 %1344  ;;  %v1364_v22 = vsel %vm538_vm1, %v1347_v16, 0 }
  0xc0   : > { %v1348_v12 = vsel %vm1346_vm10, %v1343_v9, %v1345_v8 }
  0xc1   : > { %4634 = vmatmul.mubr.msk.bf16.vlgmr.msra.gmra.mrb[4].mxu1 %vm534_vm2, %v5042_v51  ;;  %4388 = vmatmul.mubr.msk.bf16.vlgmr.msra.gmra.mrb[0].mxu0 %vm534_vm2, %v5043_v60  ;;  %v1350_v14 = vpop.permute.xlu1 %1349 }
  0xc2   : > { %4638 = vmatpush3.bf16.msra.mxu1 %v997_v1  ;;  %1124 = vmatpush1.bf16.msra.mxu0 %v1116_v63  ;;  %v1354_v24 = vsel %vm1351_vm13, %v1345_v8, %v1350_v14  ;;  %v5421_v63 = vrot.slane %v482_v53, %v1634_v54 }
  0xc3   : > { %4639 = vmatprep.mubr.msk.bf16.mxu1 %vm5101_vm4, %v5100_v21  ;;  %1155 = vmatprep.mubr.bf16.mxu0 %v5083_v0  ;;  %v1465_v13 = vpop.permute.xlu0 %1464  ;;  %v1369_v27 = vsel %vm538_vm1, %v1354_v24, 0 }
  0xc4   : > { %4643 = vmatprep.subr.bf16.mxu1 %v5100_v21  ;;  %4399 = vmatprep.subr.msk.bf16.mxu0 %vm538_vm1, %v1224_v2 }
  0xc5   : > { %v1467_v19 = vpop.permute.xlu1 %1466 }
  0xc6   : > { %v1471_v25 = vsel %vm1470_vm12, %v1465_v13, %v1467_v19 }
  0xc7   : > { %v1469_v18 = vpop.permute.xlu0 %1468  ;;  %v1488_v28 = vsel %vm538_vm1, %v1471_v25, 0 }
  0xc8   : > { %v1472_v23 = vsel %vm1470_vm12, %v1467_v19, %v1469_v18 }
  0xc9   : > { %v1474_v29 = vpop.permute.xlu1 %1473 }
  0xca   : > { %v1478_v30 = vsel %vm1475_vm14, %v1469_v18, %v1474_v29  ;;  %v2699_v29 = vld [vmem:[%s5916_s6 + $0x8] sm:$0xff] }
  0xcb   : > { %v1493_v32 = vsel %vm538_vm1, %v1478_v30, 0  ;;  %v2698_v30 = vld [vmem:[%s5916_s6] sm:$0xff] }
  0xcd   : > { %4640 = vmatmul.mubr.msk.bf16.vlgmr.msra.gmra.mrb[4].mxu1 %vm534_vm2, %v5043_v60  ;;  %4394 = vmatmul.mubr.msk.bf16.vlgmr.msra.gmra.mrb[0].mxu0 %vm534_vm2, %v5044_v7  ;;  %v5419_v60 = vrot.slane %v482_v53, %v1630_v50 }
  0xce   : > { %4644 = vmatpush3.bf16.msra.mxu1 %v1121_v10  ;;  %1248 = vmatpush1.bf16.msra.mxu0 %v1240_v11 }
  0xcf   : > { %4645 = vmatprep.mubr.msk.bf16.mxu1 %vm5101_vm4, %v5100_v21  ;;  %1279 = vmatprep.mubr.bf16.mxu0 %v5083_v0 }
  0xd0   : > { %4649 = vmatprep.subr.bf16.mxu1 %v5100_v21  ;;  %4405 = vmatprep.subr.msk.bf16.mxu0 %vm538_vm1, %v1348_v12  ;;  %v1638_v12 = vsub.s32 2, %v1629_v40 }
  0xd8   : > { %v1590_v39 = vpop.permute.xlu0 %1589 }
  0xd9   : > { %4646 = vmatmul.mubr.msk.bf16.vlgmr.msra.gmra.mrb[4].mxu1 %vm534_vm2, %v5044_v7  ;;  %4400 = vmatmul.mubr.msk.bf16.vlgmr.msra.gmra.mrb[0].mxu0 %vm534_vm2, %v5045_v17 }
  0xda   : > { %4650 = vmatpush3.bf16.msra.mxu1 %v1245_v20  ;;  %1372 = vmatpush1.bf16.msra.mxu0 %v1364_v22  ;;  %v1595_v38 = vpop.permute.xlu1 %1594  ;;  %v5435_v20 = vrot.slane %v482_v53, %v1638_v12 }
  0xdb   : > { %4651 = vmatprep.mubr.msk.bf16.mxu1 %vm5101_vm4, %v5100_v21  ;;  %1403 = vmatprep.mubr.bf16.mxu0 %v5083_v0 }
  0xdc   : > { %4655 = vmatprep.subr.bf16.mxu1 %v5100_v21  ;;  %4411 = vmatprep.subr.msk.bf16.mxu0 %vm538_vm1, %v1472_v23  ;;  %v1613_v55 = vpop.permute.xlu0 %1612  ;;  %vm4161_vm1 = vcmask 261120  }
  0xde   : > { %v1608_v46 = vpop.permute.xlu1 %1607 }
  0xe5   : > { %4652 = vmatmul.mubr.msk.bf16.vlgmr.msra.gmra.mrb[4].mxu1 %vm534_vm2, %v5045_v17  ;;  %4406 = vmatmul.mubr.msk.bf16.vlgmr.msra.gmra.mrb[0].mxu0 %vm534_vm2, %v5046_v26 }
  0xe6   : > { %4656 = vmatpush3.bf16.msra.mxu1 %v1369_v27  ;;  %1496 = vmatpush1.bf16.msra.mxu0 %v1488_v28  ;;  %v2681_v27 = vld [vmem:[%s5915_s5 + $0x8] sm:$0xff]  ;;  %v2680_v28 = vld [vmem:[%s5915_s5] sm:$0xff] }
  0xe7   : > { %4657 = vmatprep.mubr.msk.bf16.mxu1 %vm5101_vm4, %v5100_v21  ;;  %1527 = vmatprep.mubr.bf16.mxu0 %v5083_v0 }
  0xe8   : > { %4661 = vmatprep.subr.bf16.mxu1 %v5100_v21 }
  0xf1   : > { %4658 = vmatmul.mubr.msk.bf16.vlgmr.msra.gmra.mrb[4].mxu1 %vm534_vm2, %v5046_v26  ;;  %4412 = vmatmul.mubr.msk.bf16.vlgmr.msra.gmra.mrb[0].mxu0 %vm534_vm2, %v5047_v31 }
  0xf2   : > { %4662 = vmatpush3.bf16.msra.mxu1 %v1493_v32  ;;  %4663 = vmatprep.mubr.msk.bf16.mxu1 %vm5101_vm4, %v5100_v21 }
  0xf3   : > { %4667 = vmatprep.subr.bf16.mxu1 %v5100_v21  ;;  %1733 = vmatprep.mubr.bf16.mxu0 %v5083_v0 }
  0xfd   : > { %4664 = vmatmul.mubr.msk.bf16.vlgmr.msra.gmra.mrb[4].mxu1 %vm534_vm2, %v5047_v31  ;;  %vm4264_vm2 = vcmask 551936  }
  0xfe   : > { %4669 = vmatprep.mubr.msk.bf16.mxu1 %vm5101_vm4, %v5100_v21 }
 0x168   : > { %v581_v33 = vpop.f32.mrb[0].mxu1 }
 0x169   : > { %v583_v34 = vpop.f32.mrb[1].mxu1 }
 0x16a   : > { %v585_v35 = vpop.f32.mrb[2].mxu1 }
 0x16b   : > { %v587_v36 = vpop.f32.mrb[3].mxu1 }
 0x1c4   : > { %v1529_v41 = vpop.f32.mrb[0].mxu0 }
 0x1c5   : > { %v4783_v42 = vadd.f32 %v1529_v41, %v581_v33  ;;  %v1531_v43 = vpop.f32.mrb[1].mxu0 }
 0x1c6   : > { %v4784_v44 = vadd.f32 %v1531_v43, %v583_v34  ;;  %v1533_v45 = vpop.f32.mrb[2].mxu0 }
 0x1c7   : > { %v1597_v47 = vmul.f32 %v4783_v42, %v1590_v39  ;;  %v4785_v48 = vadd.f32 %v1533_v45, %v585_v35  ;;  %v1535_v49 = vpop.f32.mrb[3].mxu0 }
 0x1c8   : > { %v1598_v51 = vmul.f32 %v4784_v44, %v1590_v39  ;;  %v4786_v52 = vadd.f32 %v1535_v49, %v587_v36  ;;  %v5049_v49 = vld [vmem:[%s5914_s4] sm:$0xff]  }
 0x1c9   : > { %v1600_v56 = vmul.f32 %v4785_v48, %v1595_v38  ;;  %v1615_v57 = vadd.f32 %v1608_v46, %v1597_v47 }
 0x1ca   : > { %v1601_v58 = vmul.f32 %v4786_v52, %v1595_v38  ;;  %v1616_v59 = vadd.f32 %v1608_v46, %v1598_v51 }
 0x1cb   : > { %v1621_v61 = vmax.f32 %v1615_v57, 0.0  ;;  %v1618_v62 = vadd.f32 %v1613_v55, %v1600_v56  ;;  %v5050_v57 = vld [vmem:[%s5914_s4 + $0x10] sm:$0xff]  }
 0x1cc   : > { %v1622_v1 = vmax.f32 %v1616_v59, 0.0  ;;  %v1619_v2 = vadd.f32 %v1613_v55, %v1601_v58 }
 0x1cd   : > { %v1624_v4 = vmax.f32 %v1618_v62, 0.0  ;;  %v1643_v5 = vmul.f32 %v5419_v60, %v1621_v61 }
 0x1ce   : > { %v1625_v3 = vmax.f32 %v1619_v2, 0.0  ;;  %v1644_v7 = vmul.f32 %v5421_v63, %v1622_v1  ;;  %v5051_v1 = vld [vmem:[%s5914_s4 + $0x18] sm:$0xff]  }
 0x1cf   : > { %v1646_v6 = vmul.f32 %v5419_v60, %v1624_v4 }
 0x1d0   : > { %v1647_v8 = vmul.f32 %v5421_v63, %v1625_v3  ;;  %v1572_v9 = vpop.f32.mrb[4].mxu1 }
 0x1d1   : > { %v5427_v10 = vpack.c.bf16 %v1646_v6, %v1643_v5  ;;  %v1599_v11 = vmul.f32 %v1590_v39, %v1572_v9  ;;  %v4665_v13 = vpop.f32.mrb[5].mxu1 }
 0x1d2   : > { %v5429_v14 = vpack.c.bf16 %v1647_v8, %v1644_v7  ;;  %v1575_v15 = vpop.f32.mrb[6].mxu1  ;;  %v5052_v7 = vld [vmem:[%s5914_s4 + $0x20] sm:$0xff]  }
 0x1d3   : > { %v1617_v16 = vadd.f32 %v1608_v46, %v1599_v11  ;;  %v1602_v17 = vmul.f32 %v1595_v38, %v1575_v15  ;;  %v4666_v18 = vpop.f32.mrb[7].mxu1  ;;  %1678 = vrot.lane.b32.xlu1 %v5427_v10, %s5949_s20  ;;  %v5048_v38 = vld [vmem:[%s5914_s4 + $0x8] sm:$0xff]  }
 0x1d4   : > { %1680 = vrot.lane.b32.xlu0 %v5429_v14, %s5949_s20  ;;  %v5053_v15 = vld [vmem:[%s5914_s4 + $0x28] sm:$0xff]  }
 0x1d5   : > { %v1623_v19 = vmax.f32 %v1617_v16, 0.0  ;;  %v1620_v22 = vadd.f32 %v1613_v55, %v1602_v17 }
 0x1d7   : > { %v1626_v23 = vmax.f32 %v1620_v22, 0.0  ;;  %v1645_v24 = vmul.f32 %v5435_v20, %v1623_v19 }
 0x1d9   : > { %v1648_v25 = vmul.f32 %v5435_v20, %v1626_v23 }
 0x1db   : > { %v5439_v26 = vpack.c.bf16 %v1648_v25, %v1645_v24  ;;  %v5054_v25 = vld [vmem:[%s5914_s4 + $0x30] sm:$0xff]  }
 0x1dd   : > { %1682 = vrot.lane.b32.xlu0 %v5439_v26, %s5949_s20  ;;  %1676 = vrot.lane.b32.xlu1 %v5439_v26, %s5946_s19  ;;  %s5972_s19 = smov 50   ;;  %s5977_s20 = smov 17  }
 0x1e1   : > { %1661 = vrot.lane.b32.xlu0 %v5429_v14, %s5952_s22  ;;  %1659 = vrot.lane.b32.xlu1 %v5427_v10, %s5952_s22 }
 0x1e5   : > { %1663 = vrot.lane.b32.xlu0 %v5439_v26, %s5952_s22  ;;  %1655 = vrot.lane.b32.xlu1 %v5439_v26, %s5951_s21  ;;  %s5978_s21 = smov 78  }
 0x1e9   : > { %1884 = vrot.lane.b32.xlu0 %v5429_v14, %s5947_s24  ;;  %1882 = vrot.lane.b32.xlu1 %v5427_v10, %s5947_s24 }
 0x1ed   : > { %1886 = vrot.lane.b32.xlu0 %v5439_v26, %s5947_s24  ;;  %1880 = vrot.lane.b32.xlu1 %v5439_v26, %s5964_s27  ;;  %s5973_s24 = smov 109  }
 0x1f1   : > { %2001 = vrot.lane.b32.xlu0 %v5429_v14, %s5965_s28  ;;  %1999 = vrot.lane.b32.xlu1 %v5427_v10, %s5965_s28 }
 0x1f5   : > { %2003 = vrot.lane.b32.xlu0 %v5439_v26, %s5965_s28  ;;  %1997 = vrot.lane.b32.xlu1 %v5439_v26, %s5966_s16 }
 0x1f9   : > { %2219 = vrot.lane.b32.xlu0 %v5439_v26, %s5967_s18  ;;  %2217 = vrot.lane.b32.xlu1 %v5429_v14, %s5967_s18 }
 0x1fd   : > { %2225 = vrot.lane.b32.xlu0 %v5427_v10, %s5968_s15  ;;  %2215 = vrot.lane.b32.xlu1 %v5427_v10, %s5967_s18 }
 0x201   : > { %2336 = vrot.lane.b32.xlu0 %v5439_v26, %s5969_s25  ;;  %2334 = vrot.lane.b32.xlu1 %v5429_v14, %s5969_s25 }
 0x205   : > { %2342 = vrot.lane.b32.xlu0 %v5427_v10, %s5970_s23  ;;  %2332 = vrot.lane.b32.xlu1 %v5427_v10, %s5969_s25 }
 0x209   : > { %2453 = vrot.lane.b32.xlu0 %v5439_v26, %s5971_s26  ;;  %2451 = vrot.lane.b32.xlu1 %v5429_v14, %s5971_s26 }
 0x20d   : > { %2459 = vrot.lane.b32.xlu0 %v5427_v10, %s5972_s19  ;;  %2449 = vrot.lane.b32.xlu1 %v5427_v10, %s5971_s26 }
 0x211   : > { %2570 = vrot.lane.b32.xlu0 %v5439_v26, %s5973_s24  ;;  %2568 = vrot.lane.b32.xlu1 %v5429_v14, %s5973_s24 }
 0x215   : > { %2576 = vrot.lane.b32.xlu0 %v5427_v10, %s5099_s17  ;;  %2566 = vrot.lane.b32.xlu1 %v5427_v10, %s5973_s24 }
 0x219   : > { %2689 = vperm.xlu0 %5036, %v2681_v27   ;;  %2684 = vperm.xlu1 %5037, %v2680_v28  }
 0x21d   : > { %2707 = vperm.xlu0 %5036, %v2699_v29   ;;  %2702 = vperm.xlu1 %5037, %v2698_v30  }
 0x245   : > { %v1679_v31 = vpop.permute.xlu1 %1678 }
 0x246   : > { %v1681_v32 = vpop.permute.xlu0 %1680 }
 0x247   : > { %v1684_v33 = vsel %vm522_vm0, %v1679_v31, %v1681_v32 }
 0x248   : > { %1701 = vmatprep.subr.bf16.mxu0 %v1684_v33 }
 0x24f   : > { %v1683_v34 = vpop.permute.xlu0 %1682  ;;  %v1677_v35 = vpop.permute.xlu1 %1676 }
 0x250   : > { %v1685_v36 = vsel %vm522_vm0, %v1681_v32, %v1683_v34  ;;  %v1690_v37 = vsel %vm522_vm0, %v1677_v35, %v1679_v31  ;;  %v5055_v31 = vld [vmem:[%s5914_s4 + $0x38] sm:$0xff]  }
 0x251   : > { %1702 = vmatpush1.bf16.msra.mxu0 %v1690_v37  ;;  %4668 = vmatpush3.bf16.msra.mxu1 %v1685_v36  ;;  %v5056_v36 = vld [vmem:[%s5914_s4 + $0x40] sm:$0xff]  }
 0x252   : > { %4673 = vmatprep.subr.bf16.mxu1 %v5100_v21 }
 0x253   : > { %v1662_v39 = vpop.permute.xlu0 %1661  ;;  %v1660_v40 = vpop.permute.xlu1 %1659 }
 0x254   : > { %4417 = vmatmul.mubr.msk.bf16.vlgmr.msra.gmra.mrb[4].mxu0 %vm1697_vm15, %v5048_v38  ;;  %4670 = vmatmul.mubr.msk.bf16.vlgmr.msra.gmra.mrb[8].mxu1 %vm1697_vm15, %v5048_v38  ;;  %v1665_v41 = vsel %vm504_vm3, %v1660_v40, %v1662_v39 }
 0x255   : > { %1793 = vmatprep.subr.bf16.mxu0 %v1665_v41  ;;  %4675 = vmatprep.mubr.msk.bf16.mxu1 %vm5101_vm4, %v5100_v21 }
 0x256   : > { %1825 = vmatprep.mubr.bf16.mxu0 %v5083_v0 }
 0x257   : > { %v1664_v42 = vpop.permute.xlu0 %1663  ;;  %v1656_v43 = vpop.permute.xlu1 %1655 }
 0x258   : > { %v1666_v44 = vsel %vm504_vm3, %v1662_v39, %v1664_v42  ;;  %v1671_v45 = vsel %vm504_vm3, %v1656_v43, %v1660_v40 }
 0x259   : > { %1794 = vmatpush1.bf16.msra.mxu0 %v1671_v45  ;;  %4674 = vmatpush3.bf16.msra.mxu1 %v1666_v44 }
 0x25a   : > { %4679 = vmatprep.subr.bf16.mxu1 %v5100_v21 }
 0x25b   : > { %v1885_v46 = vpop.permute.xlu0 %1884  ;;  %v1883_v47 = vpop.permute.xlu1 %1882 }
 0x25c   : > { %v1888_v48 = vsel %vm742_vm5, %v1883_v47, %v1885_v46 }
 0x25d   : > { %1904 = vmatprep.subr.bf16.mxu0 %v1888_v48 }
 0x25f   : > { %v1887_v50 = vpop.permute.xlu0 %1886  ;;  %v1881_v51 = vpop.permute.xlu1 %1880 }
 0x260   : > { %v1889_v52 = vsel %vm742_vm5, %v1885_v46, %v1887_v50  ;;  %v1894_v53 = vsel %vm742_vm5, %v1881_v51, %v1883_v47  ;;  %4420 = vmatmul.mubr.msk.bf16.vlgmr.msra.gmra.mrb[4].mxu0 %vm1697_vm15, %v5049_v49  ;;  %4676 = vmatmul.mubr.msk.bf16.vlgmr.msra.gmra.mrb[8].mxu1 %vm1697_vm15, %v5049_v49 }
 0x261   : > { %1905 = vmatpush1.bf16.msra.mxu0 %v1894_v53  ;;  %4680 = vmatpush3.bf16.msra.mxu1 %v1889_v52 }
 0x262   : > { %4681 = vmatprep.mubr.msk.bf16.mxu1 %vm5101_vm4, %v5100_v21  ;;  %4685 = vmatprep.subr.bf16.mxu1 %v5100_v21 }
 0x263   : > { %v2002_v54 = vpop.permute.xlu0 %2001  ;;  %v2000_v55 = vpop.permute.xlu1 %1999  ;;  %1936 = vmatprep.mubr.bf16.mxu0 %v5083_v0 }
 0x264   : > { %v2005_v56 = vsel %vm866_vm6, %v2000_v55, %v2002_v54 }
 0x265   : > { %2021 = vmatprep.subr.bf16.mxu0 %v2005_v56 }
 0x267   : > { %v2004_v58 = vpop.permute.xlu0 %2003  ;;  %v1998_v59 = vpop.permute.xlu1 %1997 }
 0x268   : > { %v2006_v61 = vsel %vm866_vm6, %v2002_v54, %v2004_v58  ;;  %v2011_v62 = vsel %vm866_vm6, %v1998_v59, %v2000_v55 }
 0x26b   : > { %v2220_v2 = vpop.permute.xlu0 %2219  ;;  %v2218_v4 = vpop.permute.xlu1 %2217 }
 0x26c   : > { %4425 = vmatmul.mubr.msk.bf16.vlgmr.msra.gmra.mrb[4].mxu0 %vm1697_vm15, %v5050_v57  ;;  %4682 = vmatmul.mubr.msk.bf16.vlgmr.msra.gmra.mrb[8].mxu1 %vm1697_vm15, %v5050_v57  ;;  %v2222_v3 = vsel %vm1098_vm7, %v2218_v4, %v2220_v2 }
 0x26d   : > { %2022 = vmatpush1.bf16.msra.mxu0 %v2011_v62  ;;  %4686 = vmatpush3.bf16.msra.mxu1 %v2006_v61 }
 0x26e   : > { %2122 = vmatprep.subr.bf16.mxu0 %v5429_v14  ;;  %4687 = vmatprep.mubr.msk.bf16.mxu1 %vm5101_vm4, %v5100_v21 }
 0x26f   : > { %4691 = vmatprep.subr.bf16.mxu1 %v5100_v21  ;;  %2053 = vmatprep.mubr.bf16.mxu0 %v5083_v0  ;;  %v2226_v5 = vpop.permute.xlu0 %2225  ;;  %v2216_v6 = vpop.permute.xlu1 %2215 }
 0x270   : > { %v2221_v11 = vsel %vm1098_vm7, %v2216_v6, %v2218_v4 }
 0x273   : > { %v2337_v8 = vpop.permute.xlu0 %2336  ;;  %v2335_v9 = vpop.permute.xlu1 %2334 }
 0x274   : > { %v2339_v12 = vsel %vm1222_vm8, %v2335_v9, %v2337_v8 }
 0x277   : > { %v2343_v13 = vpop.permute.xlu0 %2342  ;;  %v2333_v14 = vpop.permute.xlu1 %2332 }
 0x278   : > { %4430 = vmatmul.mubr.msk.bf16.vlgmr.msra.gmra.mrb[4].mxu0 %vm1697_vm15, %v5051_v1  ;;  %4688 = vmatmul.mubr.msk.bf16.vlgmr.msra.gmra.mrb[8].mxu1 %vm1697_vm15, %v5051_v1  ;;  %v2346_v18 = vsel %vm1227_vm11, %v2337_v8, %v2343_v13  ;;  %v2338_v19 = vsel %vm1222_vm8, %v2333_v14, %v2335_v9 }
 0x279   : > { %2123 = vmatpush1.bf16.msra.mxu0 %v5427_v10  ;;  %4692 = vmatpush3.bf16.msra.mxu1 %v5439_v26  ;;  %v2229_v10 = vsel %vm1103_vm9, %v2220_v2, %v2226_v5 }
 0x27a   : > { %2239 = vmatprep.subr.bf16.mxu0 %v2222_v3  ;;  %4693 = vmatprep.mubr.msk.bf16.mxu1 %vm5101_vm4, %v5100_v21 }
 0x27b   : > { %4697 = vmatprep.subr.bf16.mxu1 %v5100_v21  ;;  %2154 = vmatprep.mubr.bf16.mxu0 %v5083_v0  ;;  %v2454_v16 = vpop.permute.xlu0 %2453  ;;  %v2452_v17 = vpop.permute.xlu1 %2451 }
 0x27c   : > { %v2456_v22 = vsel %vm1346_vm10, %v2452_v17, %v2454_v16 }
 0x27f   : > { %v2460_v23 = vpop.permute.xlu0 %2459  ;;  %v2450_v24 = vpop.permute.xlu1 %2449 }
 0x280   : > { %v2463_v28 = vsel %vm1351_vm13, %v2454_v16, %v2460_v23  ;;  %v2455_v29 = vsel %vm1346_vm10, %v2450_v24, %v2452_v17  ;;  %v4053_v16 = vld [vmem:[%s5918_s8 + $0x8] sm:$0xff]  ;;  %v4088_v17 = vld [vmem:[%s5919_s9] sm:$0xff]  ;;  %v4090_v23 = vld [vmem:[%s5919_s9 + $0x10] sm:$0xff] }
 0x281   : > { %v4091_v24 = vld [vmem:[%s5919_s9 + $0x18] sm:$0xff] }
 0x283   : > { %v2571_v26 = vpop.permute.xlu0 %2570  ;;  %v2569_v27 = vpop.permute.xlu1 %2568 }
 0x284   : > { %4435 = vmatmul.mubr.msk.bf16.vlgmr.msra.gmra.mrb[4].mxu0 %vm1697_vm15, %v5052_v7  ;;  %4694 = vmatmul.mubr.msk.bf16.vlgmr.msra.gmra.mrb[8].mxu1 %vm1697_vm15, %v5052_v7  ;;  %v2573_v30 = vsel %vm1470_vm12, %v2569_v27, %v2571_v26 }
 0x285   : > { %2240 = vmatpush1.bf16.msra.mxu0 %v2221_v11  ;;  %4698 = vmatpush3.bf16.msra.mxu1 %v2229_v10 }
 0x286   : > { %2356 = vmatprep.subr.bf16.mxu0 %v2339_v12  ;;  %2271 = vmatprep.mubr.bf16.mxu0 %v5083_v0 }
 0x287   : > { %4699 = vmatprep.mubr.msk.bf16.mxu1 %vm5101_vm4, %v5100_v21  ;;  %4703 = vmatprep.subr.bf16.mxu1 %v5100_v21  ;;  %v2577_v32 = vpop.permute.xlu0 %2576  ;;  %v2567_v33 = vpop.permute.xlu1 %2566 }
 0x288   : > { %v2580_v34 = vsel %vm1475_vm14, %v2571_v26, %v2577_v32  ;;  %v2572_v35 = vsel %vm1470_vm12, %v2567_v33, %v2569_v27  ;;  %v5057_v32 = vld [vmem:[%s5917_s7] sm:$0xff]  }
 0x290   : > { %4440 = vmatmul.mubr.msk.bf16.vlgmr.msra.gmra.mrb[4].mxu0 %vm1697_vm15, %v5053_v15  ;;  %4700 = vmatmul.mubr.msk.bf16.vlgmr.msra.gmra.mrb[8].mxu1 %vm1697_vm15, %v5053_v15  ;;  %v4052_v15 = vld [vmem:[%s5918_s8] sm:$0xff] }
 0x291   : > { %2357 = vmatpush1.bf16.msra.mxu0 %v2338_v19  ;;  %4704 = vmatpush3.bf16.msra.mxu1 %v2346_v18  ;;  %v4089_v18 = vld [vmem:[%s5919_s9 + $0x8] sm:$0xff]  ;;  %v4054_v19 = vld [vmem:[%s5918_s8 + $0x10] sm:$0xff] }
 0x292   : > { %2473 = vmatprep.subr.bf16.mxu0 %v2456_v22  ;;  %2388 = vmatprep.mubr.bf16.mxu0 %v5083_v0  ;;  %v4055_v22 = vld [vmem:[%s5918_s8 + $0x18] sm:$0xff] }
 0x293   : > { %4705 = vmatprep.mubr.msk.bf16.mxu1 %vm5101_vm4, %v5100_v21  ;;  %4709 = vmatprep.subr.bf16.mxu1 %v5100_v21 }
 0x298   : > { %v2685_v37 = vpop.permute.xlu1 %2684  ;;  %v2690_v38 = vpop.permute.xlu0 %2689 }
 0x29c   : > { %4706 = vmatmul.mubr.msk.bf16.vlgmr.msra.gmra.mrb[8].mxu1 %vm1697_vm15, %v5054_v25  ;;  %4445 = vmatmul.mubr.msk.bf16.vlgmr.msra.gmra.mrb[4].mxu0 %vm1697_vm15, %v5054_v25  ;;  %v2703_v39 = vpop.permute.xlu1 %2702  ;;  %v2708_v55 = vpop.permute.xlu0 %2707  ;;  %v4155_v25 = vld [vmem:[%s5921_s11] sm:$0xf] }
 0x29d   : > { %4710 = vmatpush3.bf16.msra.mxu1 %v2463_v28  ;;  %2474 = vmatpush1.bf16.msra.mxu0 %v2455_v29 }
 0x29e   : > { %2590 = vmatprep.subr.bf16.mxu0 %v2573_v30  ;;  %2505 = vmatprep.mubr.bf16.mxu0 %v5083_v0 }
 0x29f   : > { %4711 = vmatprep.mubr.msk.bf16.mxu1 %vm5101_vm4, %v5100_v21  ;;  %4715 = vmatprep.subr.bf16.mxu1 %v5100_v21 }
 0x2a8   : > { %4450 = vmatmul.mubr.msk.bf16.vlgmr.msra.gmra.mrb[4].mxu0 %vm1697_vm15, %v5055_v31  ;;  %4712 = vmatmul.mubr.msk.bf16.vlgmr.msra.gmra.mrb[8].mxu1 %vm1697_vm15, %v5055_v31 }
 0x2a9   : > { %2591 = vmatpush1.bf16.msra.mxu0 %v2572_v35  ;;  %4716 = vmatpush3.bf16.msra.mxu1 %v2580_v34 }
 0x2aa   : > { %2622 = vmatprep.mubr.bf16.mxu0 %v5083_v0  ;;  %4717 = vmatprep.mubr.msk.bf16.mxu1 %vm5101_vm4, %v5100_v21 }
 0x2b4   : > { %4455 = vmatmul.mubr.msk.bf16.vlgmr.msra.gmra.mrb[4].mxu0 %vm1697_vm15, %v5056_v36  ;;  %4718 = vmatmul.mubr.msk.bf16.vlgmr.msra.gmra.mrb[8].mxu1 %vm1697_vm15, %v5056_v36 }
 0x2b5   : > { %2941 = vmatprep.mubr.bf16.mxu0 %v5083_v0  ;;  %2823 = vmatprep.mubr.bf16.mxu1 %v5083_v0 }
 0x387   : > { %v2624_v40 = vpop.f32.mrb[4].mxu0  ;;  %v2667_v41 = vpop.f32.mrb[8].mxu1 }
 0x388   : > { %v2692_v42 = vmul.f32 %v2685_v37, %v2624_v40  ;;  %v2694_v43 = vmul.f32 %v2685_v37, %v2667_v41  ;;  %v2626_v44 = vpop.f32.mrb[5].mxu0  ;;  %v4719_v45 = vpop.f32.mrb[9].mxu1  ;;  %v5059_v41 = vld [vmem:[%s5917_s7 + $0x10] sm:$0xff]  }
 0x389   : > { %v2693_v46 = vmul.f32 %v2685_v37, %v2626_v44  ;;  %v2628_v47 = vpop.f32.mrb[6].mxu0  ;;  %v2670_v48 = vpop.f32.mrb[10].mxu1 }
 0x38a   : > { %v2710_v49 = vadd.f32 %v2703_v39, %v2692_v42  ;;  %v2712_v50 = vadd.f32 %v2703_v39, %v2694_v43  ;;  %v2695_v51 = vmul.f32 %v2690_v38, %v2628_v47  ;;  %v2697_v52 = vmul.f32 %v2690_v38, %v2670_v48  ;;  %v2630_v53 = vpop.f32.mrb[7].mxu0  ;;  %v4720_v54 = vpop.f32.mrb[11].mxu1  ;;  %v5060_v48 = vld [vmem:[%s5917_s7 + $0x20] sm:$0xff]  }
 0x38b   : > { %v2711_v56 = vadd.f32 %v2703_v39, %v2693_v46  ;;  %v2696_v57 = vmul.f32 %v2690_v38, %v2630_v53  ;;  %v5058_v38 = vld [vmem:[%s5917_s7 + $0x8] sm:$0xff]  }
 0x38c   : > { %v2716_v58 = vmax.f32 %v2710_v49, 0.0  ;;  %v2718_v59 = vmax.f32 %v2712_v50, 0.0  ;;  %v2713_v61 = vadd.f32 %v2708_v55, %v2695_v51  ;;  %v2715_v62 = vadd.f32 %v2708_v55, %v2697_v52  ;;  %v5061_v50 = vld [vmem:[%s5917_s7 + $0x18] sm:$0xff]  }
 0x38d   : > { %v2717_v1 = vmax.f32 %v2711_v56, 0.0  ;;  %v2714_v2 = vadd.f32 %v2708_v55, %v2696_v57  ;;  %v5062_v55 = vld [vmem:[%s5917_s7 + $0x28] sm:$0xff]  }
 0x38e   : > { %v2719_v4 = vmax.f32 %v2713_v61, 0.0  ;;  %v2721_v3 = vmax.f32 %v2715_v62, 0.0  ;;  %v2722_v6 = vmul.f32 %v2716_v58, %v5419_v60  ;;  %v2724_v7 = vmul.f32 %v2718_v59, %v5435_v20  ;;  %v5063_v58 = vld [vmem:[%s5917_s7 + $0x30] sm:$0xff]  }
 0x38f   : > { %v2720_v5 = vmax.f32 %v2714_v2, 0.0  ;;  %v2723_v10 = vmul.f32 %v2717_v1, %v5421_v63  ;;  %v5064_v2 = vld [vmem:[%s5917_s7 + $0x38] sm:$0xff]  }
 0x390   : > { %v2725_v8 = vmul.f32 %v2719_v4, %v5419_v60  ;;  %v2727_v9 = vmul.f32 %v2721_v3, %v5435_v20 }
 0x391   : > { %v2726_v11 = vmul.f32 %v2720_v5, %v5421_v63  ;;  %v5065_v5 = vld [vmem:[%s5917_s7 + $0x40] sm:$0xff]  }
 0x392   : > { %v5625_v12 = vpack.c.bf16 %v2725_v8, %v2722_v6  ;;  %v5627_v13 = vpack.c.bf16 %v2727_v9, %v2724_v7 }
 0x393   : > { %v5629_v14 = vpack.c.bf16 %v2726_v11, %v2723_v10  ;;  %v5066_v10 = vld [vmem:[%s5917_s7 + $0x48] sm:$0xff]  }
 0x394   : > { %2740 = vrot.lane.b32.xlu1 %v5625_v12, %s5974_s2 }
 0x395   : > { %2742 = vrot.lane.b32.xlu0 %v5629_v14, %s5974_s2 }
 0x398   : > { %2736 = vrot.lane.b32.xlu1 %v5627_v13, %s5975_s3 }
 0x399   : > { %2761 = vrot.lane.b32.xlu0 %v5625_v12, %s5976_s12 }
 0x39c   : > { %3018 = vrot.lane.b32.xlu1 %v5625_v12, %s5977_s20 }
 0x39d   : > { %2759 = vrot.lane.b32.xlu0 %v5627_v13, %s5978_s21 }
 0x3a0   : > { %2763 = vrot.lane.b32.xlu1 %v5629_v14, %s5976_s12 }
 0x3a1   : > { %3020 = vrot.lane.b32.xlu0 %v5629_v14, %s5977_s20 }
 0x3a4   : > { %3016 = vrot.lane.b32.xlu1 %v5627_v13, %s5964_s27 }
 0x3a5   : > { %2765 = vrot.lane.b32.xlu0 %v5627_v13, %s5976_s12  ;;  %s5008_s12 = smul.u32 96, %s5981_s30 }
 0x3a7   : > { %s5861_s27 = scalar_lea.vmem %s5923_s13, %s5008_s12 }
 0x3a8   : > { %3169 = vrot.lane.b32.xlu1 %v5625_v12, %s5965_s28 }
 0x3a9   : > { %3171 = vrot.lane.b32.xlu0 %v5629_v14, %s5965_s28 }
 0x3ac   : > { %3167 = vrot.lane.b32.xlu1 %v5627_v13, %s5966_s16 }
 0x3ad   : > { %2744 = vrot.lane.b32.xlu0 %v5627_v13, %s5974_s2 }
 0x3b0   : > { %3022 = vrot.lane.b32.xlu1 %v5627_v13, %s5977_s20 }
 0x3b1   : > { %3455 = vrot.lane.b32.xlu0 %v5629_v14, %s5967_s18 }
 0x3b4   : > { %3457 = vrot.lane.b32.xlu1 %v5627_v13, %s5967_s18 }
 0x3b5   : > { %3453 = vrot.lane.b32.xlu0 %v5625_v12, %s5967_s18  ;;  %s5979_s18 = smul.u32 12, %s5981_s30 }
 0x3b8   : > { %3173 = vrot.lane.b32.xlu1 %v5627_v13, %s5965_s28 }
 0x3b9   : > { %3606 = vrot.lane.b32.xlu0 %v5629_v14, %s5969_s25 }
 0x3bc   : > { %3608 = vrot.lane.b32.xlu1 %v5627_v13, %s5969_s25 }
 0x3bd   : > { %3604 = vrot.lane.b32.xlu0 %v5625_v12, %s5969_s25 }
 0x3c0   : > { %3463 = vrot.lane.b32.xlu1 %v5625_v12, %s5968_s15 }
 0x3c1   : > { %3757 = vrot.lane.b32.xlu0 %v5629_v14, %s5971_s26 }
 0x3c4   : > { %3759 = vrot.lane.b32.xlu1 %v5627_v13, %s5971_s26 }
 0x3c5   : > { %3755 = vrot.lane.b32.xlu0 %v5625_v12, %s5971_s26 }
 0x3c8   : > { %3614 = vrot.lane.b32.xlu1 %v5625_v12, %s5970_s23 }
 0x3c9   : > { %3908 = vrot.lane.b32.xlu0 %v5629_v14, %s5973_s24 }
 0x3cc   : > { %3910 = vrot.lane.b32.xlu1 %v5627_v13, %s5973_s24 }
 0x3cd   : > { %3906 = vrot.lane.b32.xlu0 %v5625_v12, %s5973_s24  ;;  %s480_s24 = scalar_lea.vmem %s5924_s14, %s5979_s18 }
 0x3d0   : > { %3765 = vrot.lane.b32.xlu1 %v5625_v12, %s5972_s19 }
 0x3d1   : > { %3916 = vrot.lane.b32.xlu0 %v5625_v12, %s5099_s17 }
 0x3d4   : > { %4058 = vperm.xlu1 %5037, %v4052_v15  }
 0x3d5   : > { %4063 = vperm.xlu0 %5036, %v4053_v16  }
 0x3d8   : > { %4094 = vperm.xlu1 %5037, %v4088_v17  }
 0x3d9   : > { %4099 = vperm.xlu0 %5036, %v4089_v18  }
 0x3dc   : > { %4068 = vperm.xlu1 %5037, %v4054_v19  }
 0x3dd   : > { %4073 = vperm.xlu0 %5036, %v4055_v22  }
 0x3e0   : > { %4104 = vperm.xlu1 %5037, %v4090_v23  }
 0x3e1   : > { %4109 = vperm.xlu0 %5036, %v4091_v24  }
 0x3e4   : > { %4158 = vperm.xlu1 %5037, %v4155_v25   ;;  %v5069_v25 = vld [vmem:[%s5917_s7 + $0x60] sm:$0xff]  }
 0x406   : > { %v2741_v26 = vpop.permute.xlu1 %2740 }
 0x407   : > { %v2743_v27 = vpop.permute.xlu0 %2742 }
 0x408   : > { %v2746_v28 = vsel %vm504_vm3, %v2741_v26, %v2743_v27 }
 0x409   : > { %2909 = vmatprep.subr.bf16.mxu0 %v2746_v28 }
 0x40a   : > { %v2737_v29 = vpop.permute.xlu1 %2736 }
 0x40b   : > { %v2752_v30 = vsel %vm504_vm3, %v2737_v29, %v2741_v26  ;;  %v2762_v31 = vpop.permute.xlu0 %2761 }
 0x40c   : > { %2910 = vmatpush1.bf16.msra.mxu0 %v2752_v30 }
 0x40e   : > { %v3019_v33 = vpop.permute.xlu1 %3018 }
 0x40f   : > { %v2760_v34 = vpop.permute.xlu0 %2759  ;;  %4469 = vmatmul.mubr.msk.bf16.vlgmr.msra.gmra.mrb[8].mxu0 %vm1697_vm15, %v5057_v32 }
 0x410   : > { %2951 = vmatprep.mubr.bf16.mxu0 %v5083_v0  ;;  %v2773_v39 = vsel %vm522_vm0, %v2760_v34, %v2762_v31  ;;  %v5071_v34 = vld [vmem:[%s5917_s7 + $0x70] sm:$0xff]  }
 0x412   : > { %v2764_v35 = vpop.permute.xlu1 %2763 }
 0x413   : > { %v3021_v36 = vpop.permute.xlu0 %3020  ;;  %v2767_v37 = vsel %vm522_vm0, %v2762_v31, %v2764_v35  ;;  %v5070_v31 = vld [vmem:[%s5917_s7 + $0x68] sm:$0xff]  }
 0x414   : > { %2791 = vmatprep.subr.bf16.mxu1 %v2767_v37  ;;  %v3024_v40 = vsel %vm742_vm5, %v3019_v33, %v3021_v36 }
 0x415   : > { %2792 = vmatpush1.bf16.msra.mxu1 %v2773_v39  ;;  %3048 = vmatprep.subr.bf16.mxu0 %v3024_v40  ;;  %v5073_v39 = vld [vmem:[%s5917_s7 + $0x80] sm:$0xff]   ;;  %v5074_v40 = vld [vmem:[%s5917_s7 + $0x88] sm:$0xff]  }
 0x416   : > { %v3017_v42 = vpop.permute.xlu1 %3016 }
 0x417   : > { %v3030_v43 = vsel %vm742_vm5, %v3017_v42, %v3019_v33  ;;  %v2766_v44 = vpop.permute.xlu0 %2765  ;;  %4470 = vmatmul.mubr.msk.bf16.gmra.mrb[12].mxu0 %vm1697_vm15, %v5058_v38 }
 0x418   : > { %4463 = vmatmul.mubr.msk.bf16.vlgmr.msra.gmra.mrb[12].mxu1 %vm1697_vm15, %v5059_v41  ;;  %3049 = vmatpush1.bf16.msra.mxu0 %v3030_v43  ;;  %v2768_v45 = vsel %vm522_vm0, %v2764_v35, %v2766_v44  ;;  %vm4248_vm0 = vcmask 556032  }
 0x419   : > { %4721 = vmatprep.subr.bf16.mxu1 %v2768_v45  ;;  %3080 = vmatprep.mubr.bf16.mxu0 %v5083_v0 }
 0x41a   : > { %4722 = vmatpush3.bf16.msra.mxu1 %v2768_v45  ;;  %v3170_v46 = vpop.permute.xlu1 %3169  ;;  %2833 = vmatprep.mubr.bf16.mxu1 %v5083_v0 }
 0x41b   : > { %v3172_v47 = vpop.permute.xlu0 %3171 }
 0x41c   : > { %v3175_v49 = vsel %vm866_vm6, %v3170_v46, %v3172_v47 }
 0x41d   : > { %3199 = vmatprep.subr.bf16.mxu0 %v3175_v49 }
 0x41e   : > { %v3168_v51 = vpop.permute.xlu1 %3167 }
 0x41f   : > { %v3181_v52 = vsel %vm866_vm6, %v3168_v51, %v3170_v46  ;;  %v2745_v53 = vpop.permute.xlu0 %2744  ;;  %4479 = vmatmul.mubr.msk.bf16.vlgmr.msra.gmra.mrb[8].mxu0 %vm1697_vm15, %v5060_v48 }
 0x420   : > { %4464 = vmatmul.mubr.msk.bf16.gmra.mrb[16].mxu1 %vm1697_vm15, %v5061_v50  ;;  %3200 = vmatpush1.bf16.msra.mxu0 %v3181_v52  ;;  %v2747_v54 = vsel %vm504_vm3, %v2743_v27, %v2745_v53 }
 0x421   : > { %4727 = vmatprep.subr.bf16.mxu1 %v2747_v54  ;;  %3334 = vmatprep.subr.bf16.mxu0 %v5629_v14  ;;  %v5067_v14 = vld [vmem:[%s5917_s7 + $0x50] sm:$0xff]  }
 0x422   : > { %3090 = vmatprep.mubr.bf16.mxu0 %v5083_v0  ;;  %4723 = vmatprep.mubr.msk.bf16.mxu1 %vm1697_vm15, %v5059_v41  ;;  %v3023_v56 = vpop.permute.xlu1 %3022 }
 0x423   : > { %v3025_v57 = vsel %vm742_vm5, %v3021_v36, %v3023_v56  ;;  %v3456_v61 = vpop.permute.xlu0 %3455 }
 0x426   : > { %v3458_v59 = vpop.permute.xlu1 %3457 }
 0x427   : > { %4480 = vmatmul.mubr.msk.bf16.gmra.mrb[12].mxu0 %vm1697_vm15, %v5062_v55  ;;  %v3460_v62 = vsel %vm1098_vm7, %v3456_v61, %v3458_v59  ;;  %v3454_v3 = vpop.permute.xlu0 %3453 }
 0x428   : > { %4724 = vmatmul.mubr.msk.bf16.vlgmr.msra.gmra.mrb[20].mxu1 %vm1697_vm15, %v5061_v50  ;;  %3231 = vmatprep.mubr.bf16.mxu0 %v5083_v0  ;;  %v3459_v7 = vsel %vm1098_vm7, %v3454_v3, %v3456_v61 }
 0x429   : > { %4728 = vmatpush3.bf16.msra.mxu1 %v2747_v54  ;;  %4729 = vmatprep.mubr.msk.bf16.mxu1 %vm1697_vm15, %v5057_v32 }
 0x42a   : > { %4733 = vmatprep.subr.bf16.mxu1 %v3025_v57  ;;  %v3174_v1 = vpop.permute.xlu1 %3173 }
 0x42b   : > { %v3176_v4 = vsel %vm866_vm6, %v3172_v47, %v3174_v1  ;;  %v3607_v8 = vpop.permute.xlu0 %3606 }
 0x42e   : > { %v3609_v6 = vpop.permute.xlu1 %3608 }
 0x42f   : > { %4489 = vmatmul.mubr.msk.bf16.vlgmr.msra.gmra.mrb[8].mxu0 %vm1697_vm15, %v5063_v58  ;;  %v3611_v9 = vsel %vm1222_vm8, %v3607_v8, %v3609_v6 }
 0x430   : > { %3335 = vmatpush1.bf16.msra.mxu0 %v5625_v12  ;;  %3241 = vmatprep.mubr.bf16.mxu0 %v5083_v0  ;;  %v3605_v12 = vpop.permute.xlu0 %3604 }
 0x431   : > { %3485 = vmatprep.subr.bf16.mxu0 %v3460_v62  ;;  %v3610_v17 = vsel %vm1222_vm8, %v3605_v12, %v3607_v8 }
 0x432   : > { %v3464_v11 = vpop.permute.xlu1 %3463 }
 0x433   : > { %v3467_v16 = vsel %vm1103_vm9, %v3458_v59, %v3464_v11 }
 0x434   : > { %4730 = vmatmul.mubr.msk.bf16.vlgmr.msra.gmra.mrb[20].mxu1 %vm1697_vm15, %v5058_v38  ;;  %v3758_v18 = vpop.permute.xlu0 %3757  ;;  %v5072_v38 = vld [vmem:[%s5917_s7 + $0x78] sm:$0xff]  }
 0x435   : > { %4734 = vmatpush3.bf16.msra.mxu1 %v3025_v57  ;;  %4735 = vmatprep.mubr.msk.bf16.mxu1 %vm1697_vm15, %v5060_v48 }
 0x436   : > { %4739 = vmatprep.subr.bf16.mxu1 %v3176_v4  ;;  %v3760_v15 = vpop.permute.xlu1 %3759 }
 0x437   : > { %4490 = vmatmul.mubr.msk.bf16.gmra.mrb[12].mxu0 %vm1697_vm15, %v5064_v2  ;;  %v3762_v19 = vsel %vm1346_vm10, %v3758_v18, %v3760_v15 }
 0x438   : > { %3366 = vmatprep.mubr.bf16.mxu0 %v5083_v0  ;;  %v3756_v23 = vpop.permute.xlu0 %3755 }
 0x439   : > { %v3761_v27 = vsel %vm1346_vm10, %v3756_v23, %v3758_v18 }
 0x43a   : > { %v3615_v22 = vpop.permute.xlu1 %3614 }
 0x43b   : > { %v3618_v24 = vsel %vm1227_vm11, %v3609_v6, %v3615_v22 }
 0x43c   : > { %v3909_v28 = vpop.permute.xlu0 %3908 }
 0x43e   : > { %v3911_v26 = vpop.permute.xlu1 %3910 }
 0x43f   : > { %4499 = vmatmul.mubr.msk.bf16.vlgmr.msra.gmra.mrb[8].mxu0 %vm1697_vm15, %v5065_v5  ;;  %v3913_v29 = vsel %vm1470_vm12, %v3909_v28, %v3911_v26 }
 0x440   : > { %3486 = vmatpush1.bf16.msra.mxu0 %v3459_v7  ;;  %4736 = vmatmul.mubr.msk.bf16.vlgmr.msra.gmra.mrb[20].mxu1 %vm1697_vm15, %v5062_v55  ;;  %v3907_v33 = vpop.permute.xlu0 %3906 }
 0x441   : > { %4740 = vmatpush3.bf16.msra.mxu1 %v3176_v4  ;;  %3636 = vmatprep.subr.bf16.mxu0 %v3611_v9  ;;  %v3912_v36 = vsel %vm1470_vm12, %v3907_v33, %v3909_v28 }
 0x442   : > { %4745 = vmatprep.subr.bf16.mxu1 %v5627_v13  ;;  %3376 = vmatprep.mubr.bf16.mxu0 %v5083_v0  ;;  %v3766_v30 = vpop.permute.xlu1 %3765 }
 0x443   : > { %4741 = vmatprep.mubr.msk.bf16.mxu1 %vm1697_vm15, %v5063_v58  ;;  %v3769_v32 = vsel %vm1351_vm13, %v3760_v15, %v3766_v30 }
 0x444   : > { %v3917_v35 = vpop.permute.xlu0 %3916 }
 0x445   : > { %v3920_v37 = vsel %vm1475_vm14, %v3911_v26, %v3917_v35 }
 0x447   : > { %4500 = vmatmul.mubr.msk.bf16.gmra.mrb[12].mxu0 %vm1697_vm15, %v5066_v10 }
 0x448   : > { %3517 = vmatprep.mubr.bf16.mxu0 %v5083_v0 }
 0x44c   : > { %4742 = vmatmul.mubr.msk.bf16.vlgmr.msra.gmra.mrb[20].mxu1 %vm1697_vm15, %v5064_v2 }
 0x44d   : > { %4746 = vmatpush3.bf16.msra.mxu1 %v5627_v13  ;;  %4747 = vmatprep.mubr.msk.bf16.mxu1 %vm1697_vm15, %v5065_v5  ;;  %v5068_v13 = vld [vmem:[%s5917_s7 + $0x58] sm:$0xff]  }
 0x44e   : > { %4751 = vmatprep.subr.bf16.mxu1 %v3467_v16 }
 0x44f   : > { %4509 = vmatmul.mubr.msk.bf16.vlgmr.msra.gmra.mrb[8].mxu0 %vm1697_vm15, %v5067_v14 }
 0x450   : > { %3637 = vmatpush1.bf16.msra.mxu0 %v3610_v17  ;;  %3527 = vmatprep.mubr.bf16.mxu0 %v5083_v0 }
 0x451   : > { %3787 = vmatprep.subr.bf16.mxu0 %v3762_v19 }
 0x453   : > { %v4059_v49 = vpop.permute.xlu1 %4058 }
 0x454   : > { %v4064_v50 = vpop.permute.xlu0 %4063 }
 0x457   : > { %4510 = vmatmul.mubr.msk.bf16.gmra.mrb[12].mxu0 %vm1697_vm15, %v5068_v13  ;;  %v4095_v51 = vpop.permute.xlu1 %4094 }
 0x458   : > { %4748 = vmatmul.mubr.msk.bf16.vlgmr.msra.gmra.mrb[20].mxu1 %vm1697_vm15, %v5066_v10  ;;  %3668 = vmatprep.mubr.bf16.mxu0 %v5083_v0  ;;  %v4100_v53 = vpop.permute.xlu0 %4099 }
 0x459   : > { %4752 = vmatpush3.bf16.msra.mxu1 %v3467_v16  ;;  %4753 = vmatprep.mubr.msk.bf16.mxu1 %vm1697_vm15, %v5067_v14 }
 0x45a   : > { %4757 = vmatprep.subr.bf16.mxu1 %v3618_v24 }
 0x45b   : > { %v4069_v56 = vpop.permute.xlu1 %4068 }
 0x45c   : > { %v4074_v6 = vpop.permute.xlu0 %4073 }
 0x45f   : > { %4519 = vmatmul.mubr.msk.bf16.vlgmr.msra.gmra.mrb[8].mxu0 %vm1697_vm15, %v5069_v25  ;;  %v4105_v9 = vpop.permute.xlu1 %4104 }
 0x460   : > { %3788 = vmatpush1.bf16.msra.mxu0 %v3761_v27  ;;  %3678 = vmatprep.mubr.bf16.mxu0 %v5083_v0 }
 0x461   : > { %3938 = vmatprep.subr.bf16.mxu0 %v3913_v29 }
 0x464   : > { %4754 = vmatmul.mubr.msk.bf16.vlgmr.msra.gmra.mrb[20].mxu1 %vm1697_vm15, %v5068_v13 }
 0x465   : > { %4758 = vmatpush3.bf16.msra.mxu1 %v3618_v24  ;;  %4759 = vmatprep.mubr.msk.bf16.mxu1 %vm1697_vm15, %v5069_v25 }
 0x466   : > { %4763 = vmatprep.subr.bf16.mxu1 %v3769_v32 }
 0x467   : > { %4520 = vmatmul.mubr.msk.bf16.gmra.mrb[12].mxu0 %vm1697_vm15, %v5070_v31 }
 0x468   : > { %3819 = vmatprep.mubr.bf16.mxu0 %v5083_v0 }
 0x46f   : > { %4529 = vmatmul.mubr.msk.bf16.vlgmr.msra.gmra.mrb[8].mxu0 %vm1697_vm15, %v5071_v34 }
 0x470   : > { %3939 = vmatpush1.bf16.msra.mxu0 %v3912_v36  ;;  %4760 = vmatmul.mubr.msk.bf16.vlgmr.msra.gmra.mrb[20].mxu1 %vm1697_vm15, %v5070_v31 }
 0x471   : > { %4764 = vmatpush3.bf16.msra.mxu1 %v3769_v32  ;;  %3829 = vmatprep.mubr.bf16.mxu0 %v5083_v0 }
 0x472   : > { %4769 = vmatprep.subr.bf16.mxu1 %v3920_v37  ;;  %4765 = vmatprep.mubr.msk.bf16.mxu1 %vm1697_vm15, %v5071_v34 }
 0x477   : > { %4530 = vmatmul.mubr.msk.bf16.gmra.mrb[12].mxu0 %vm1697_vm15, %v5072_v38 }
 0x478   : > { %3970 = vmatprep.mubr.bf16.mxu0 %v5083_v0 }
 0x47c   : > { %4766 = vmatmul.mubr.msk.bf16.vlgmr.msra.gmra.mrb[20].mxu1 %vm1697_vm15, %v5072_v38 }
 0x47d   : > { %4770 = vmatpush3.bf16.msra.mxu1 %v3920_v37  ;;  %4771 = vmatprep.mubr.msk.bf16.mxu1 %vm1697_vm15, %v5073_v39  ;;  %v4110_v37 = vpop.permute.xlu0 %4109 }
 0x47f   : > { %4539 = vmatmul.mubr.msk.bf16.vlgmr.msra.gmra.mrb[8].mxu0 %vm1697_vm15, %v5073_v39 }
 0x480   : > { %3980 = vmatprep.mubr.bf16.mxu0 %v5083_v0 }
 0x487   : > { %4540 = vmatmul.mubr.msk.bf16.gmra.mrb[12].mxu0 %vm1697_vm15, %v5074_v40 }
 0x488   : > { %4772 = vmatmul.mubr.msk.bf16.vlgmr.msra.gmra.mrb[20].mxu1 %vm1697_vm15, %v5074_v40 }
 0x489   : > { %4197 = vmatprep.mubr.bf16.mxu1 %v5083_v0 }
 0x4eb   : > { %v2825_v41 = vpop.f32.mrb[12].mxu1 }
 0x4ec   : > { %v2827_v42 = vpop.f32.mrb[13].mxu1 }
 0x4ed   : > { %v2829_v43 = vpop.f32.mrb[14].mxu1 }
 0x4ee   : > { %v2831_v44 = vpop.f32.mrb[15].mxu1 }
 0x4f3   : > { %v2835_v45 = vpop.f32.mrb[16].mxu1 }
 0x4f4   : > { %v2837_v46 = vpop.f32.mrb[17].mxu1 }
 0x4f5   : > { %v2839_v47 = vpop.f32.mrb[18].mxu1 }
 0x4f6   : > { %v2841_v48 = vpop.f32.mrb[19].mxu1 }
 0x552   : > { %v3972_v52 = vpop.f32.mrb[8].mxu0 }
 0x553   : > { %v4787_v54 = vadd.f32 %v3972_v52, %v2825_v41  ;;  %v3974_v55 = vpop.f32.mrb[9].mxu0 }
 0x554   : > { %v4788_v57 = vadd.f32 %v3974_v55, %v2827_v42  ;;  %v3976_v58 = vpop.f32.mrb[10].mxu0 }
 0x555   : > { %v4076_v0 = vmul.f32 %v4787_v54, %v4059_v49  ;;  %v4789_v59 = vadd.f32 %v3976_v58, %v2829_v43  ;;  %v3978_v61 = vpop.f32.mrb[11].mxu0 }
 0x556   : > { %v4077_v62 = vmul.f32 %v4788_v57, %v4059_v49  ;;  %v4790_v1 = vadd.f32 %v3978_v61, %v2831_v44 }
 0x557   : > { %v4112_v2 = vadd.f32 %v4095_v51, %v4076_v0  ;;  %v4079_v4 = vmul.f32 %v4789_v59, %v4064_v50 }
 0x558   : > { %v4113_v3 = vadd.f32 %v4095_v51, %v4077_v62  ;;  %v4080_v5 = vmul.f32 %v4790_v1, %v4064_v50 }
 0x559   : > { %v4124_v7 = vmax.f32 %v4112_v2, 0.0  ;;  %v4115_v8 = vadd.f32 %v4100_v53, %v4079_v4 }
 0x55a   : > { %v4125_v10 = vmax.f32 %v4113_v3, 0.0  ;;  %v4116_v11 = vadd.f32 %v4100_v53, %v4080_v5  ;;  %v3982_v12 = vpop.f32.mrb[12].mxu0 }
 0x55b   : > { %v5864_v14 = vmul.f32 %v4124_v7, %v5419_v60  ;;  %v4127_v15 = vmax.f32 %v4115_v8, 0.0  ;;  %v4791_v16 = vadd.f32 %v3982_v12, %v2835_v45  ;;  %v3984_v17 = vpop.f32.mrb[13].mxu0  ;;  %v4773_v18 = vpop.f32.mrb[20].mxu1 }
 0x55c   : > { %v4128_v19 = vmax.f32 %v4116_v11, 0.0  ;;  %v4792_v13 = vadd.f32 %v3984_v17, %v2837_v46  ;;  %v4084_v22 = vmul.f32 %v4773_v18, %v4069_v56  ;;  %v3986_v23 = vpop.f32.mrb[14].mxu0  ;;  %v4025_v24 = vpop.f32.mrb[21].mxu1  ;;  %v4137_v25 = vmul.f32 %v4125_v10, %v5421_v63 }
 0x55d   : > { %4246 = vst [vmem:[%s5861_s27] sm:$0xff] %v5864_v14  ;;  %v4139_v26 = vmul.f32 %v4127_v15, %v5419_v60  ;;  %v4082_v27 = vmul.f32 %v4791_v16, %v4069_v56  ;;  %v4793_v28 = vadd.f32 %v3986_v23, %v2839_v47  ;;  %v4078_v29 = vmul.f32 %v4059_v49, %v4025_v24  ;;  %v3988_v30 = vpop.f32.mrb[15].mxu0  ;;  %v4774_v31 = vpop.f32.mrb[22].mxu1 }
 0x55e   : > { %v4083_v32 = vmul.f32 %v4792_v13, %v4069_v56  ;;  %v4120_v33 = vadd.f32 %v4105_v9, %v4084_v22  ;;  %v4794_v34 = vadd.f32 %v3988_v30, %v2841_v48  ;;  %v4087_v35 = vmul.f32 %v4774_v31, %v4074_v6  ;;  %v4028_v36 = vpop.f32.mrb[23].mxu1  ;;  %4247 = vst [vmem:[%s5861_s27 + $0x8] sm:$0xff] %v4137_v25 }
 0x55f   : > { %4250 = vst [vmem:[%s5861_s27 + $0x18] sm:$0xff] %v4139_v26  ;;  %v4118_v38 = vadd.f32 %v4105_v9, %v4082_v27  ;;  %v4085_v39 = vmul.f32 %v4793_v28, %v4074_v6  ;;  %v4114_v40 = vadd.f32 %v4095_v51, %v4078_v29  ;;  %v4081_v41 = vmul.f32 %v4064_v50, %v4028_v36 }
 0x560   : > { %v4119_v42 = vadd.f32 %v4105_v9, %v4083_v32  ;;  %v4132_v43 = vmax.f32 %v4120_v33, 0.0  ;;  %v4086_v44 = vmul.f32 %v4794_v34, %v4074_v6  ;;  %v4123_v45 = vadd.f32 %v4110_v37, %v4087_v35 }
 0x561   : > { %v4130_v46 = vmax.f32 %v4118_v38, 0.0  ;;  %v4121_v47 = vadd.f32 %v4110_v37, %v4085_v39  ;;  %v4126_v49 = vmax.f32 %v4114_v40, 0.0  ;;  %v4117_v52 = vadd.f32 %v4100_v53, %v4081_v41 }
 0x562   : > { %v4131_v48 = vmax.f32 %v4119_v42, 0.0  ;;  %v4144_v54 = vmul.f32 %v4132_v43, %v5435_v20  ;;  %v4122_v55 = vadd.f32 %v4110_v37, %v4086_v44  ;;  %v4135_v56 = vmax.f32 %v4123_v45, 0.0 }
 0x563   : > { %v4142_v51 = vmul.f32 %v4130_v46, %v5419_v60  ;;  %v4133_v50 = vmax.f32 %v4121_v47, 0.0  ;;  %v4138_v57 = vmul.f32 %v4126_v49, %v5435_v20  ;;  %v4129_v58 = vmax.f32 %v4117_v52, 0.0 }
 0x564   : > { %4255 = vst.msk [vmem:[%s5861_s27 + $0x40] sm:$0xff] %vm4248_vm0, %v4144_v54  ;;  %v4134_v0 = vmax.f32 %v4122_v55, 0.0  ;;  %v4147_v53 = vmul.f32 %v4135_v56, %v5435_v20  ;;  %v4140_v59 = vmul.f32 %v4128_v19, %v5421_v63  ;;  %v4149_v61 = vpack.c.bf16 %v4139_v26, %v5864_v14 }
 0x565   : > { %4253 = vst [vmem:[%s5861_s27 + $0x30] sm:$0xff] %v4142_v51  ;;  %v4145_v62 = vmul.f32 %v4133_v50, %v5419_v60  ;;  %4249 = vst.msk [vmem:[%s5861_s27 + $0x10] sm:$0xff] %vm4248_vm0, %v4138_v57  ;;  %v4141_v1 = vmul.f32 %v4129_v58, %v5435_v20  ;;  %v4143_v2 = vmul.f32 %v4131_v48, %v5421_v63  ;;  %v4148_v20 = vld [vmem:[%s5920_s10] sm:$0x3] }
 0x566   : > { %v4154_v4 = vpack.c.bf16 %v4147_v53, %v4144_v54  ;;  %4258 = vst.msk [vmem:[%s5861_s27 + $0x58] sm:$0xff] %vm4248_vm0, %v4147_v53  ;;  %v4150_v3 = vpack.c.bf16 %v4140_v59, %v4137_v25  ;;  %4251 = vst [vmem:[%s5861_s27 + $0x20] sm:$0xff] %v4140_v59  ;;  %v4146_v5 = vmul.f32 %v4134_v0, %v5421_v63  ;;  %v4159_v63 = vpop.permute.xlu1 %4158 }
 0x567   : > { %4256 = vst [vmem:[%s5861_s27 + $0x48] sm:$0xff] %v4145_v62  ;;  %v4151_v6 = vpack.c.bf16 %v4141_v1, %v4138_v57  ;;  %4252 = vst.msk [vmem:[%s5861_s27 + $0x28] sm:$0xff] %vm4248_vm0, %v4141_v1  ;;  %v4152_v60 = vpack.c.bf16 %v4145_v62, %v4142_v51 }
 0x568   : > { %4254 = vst [vmem:[%s5861_s27 + $0x38] sm:$0xff] %v4143_v2  ;;  %4165 = vmatprep.subr.bf16.mxu1 %v4150_v3  ;;  %v4153_v7 = vpack.c.bf16 %v4146_v5, %v4143_v2  ;;  %4257 = vst [vmem:[%s5861_s27 + $0x50] sm:$0xff] %v4146_v5 }
 0x569   : > { %4166 = vmatpush1.bf16.msra.mxu1 %v4149_v61 }
 0x56a   : > { %4167 = vmatprep.subr.bf16.mxu1 %v4153_v7 }
 0x56d   : > { %4168 = vmatpush1.bf16.msra.mxu1 %v4152_v60 }
 0x56e   : > { %4775 = vmatprep.subr.bf16.mxu1 %v5100_v21 }
 0x570   : > { %4543 = vmatmul.mubr.msk.bf16.vlgmr.msra.gmra.mrb[24].mxu1 %vm4161_vm1, %v4148_v20 }
 0x571   : > { %4776 = vmatpush3.bf16.msra.mxu1 %v4151_v6  ;;  %4779 = vmatprep.mubr.msk.bf16.mxu1 %vm5101_vm4, %v5100_v21 }
 0x572   : > { %4777 = vmatprep.subr.bf16.mxu1 %v5100_v21 }
 0x575   : > { %4778 = vmatpush3.bf16.msra.mxu1 %v4154_v4 }
 0x578   : > { %4780 = vmatmul.mubr.msk.bf16.vlgmr.msra.gmra.mrb[28].mxu1 %vm4161_vm1, %v4148_v20 }
 0x643   : > { %v4199_v8 = vpop.f32.mrb[24].mxu1 }
 0x644   : > { %v4200_v9 = vadd.f32 %v4199_v8, %v4159_v63  ;;  %v4201_v10 = vpop.f32.mrb[25].mxu1 }
 0x645   : > { %v4202_v11 = vadd.f32 %v4201_v10, %v4159_v63  ;;  %v4203_v12 = vpop.f32.mrb[26].mxu1 }
 0x646   : > { %v4204_v14 = vpop.f32.mrb[27].mxu1 }
 0x647   : > { %v4261_v15 = vcombine.low %v4200_v9, %v4202_v11 }
 0x649   : > { %4263 = vst [vmem:[%s480_s24] sm:$0xff] %v4261_v15 }
 0x64b   : > { %v4240_v16 = vpop.f32.mrb[28].mxu1 }
 0x64c   : > { %v4241_v17 = vadd.f32 %v4240_v16, %v4159_v63  ;;  %v4781_v21 = vpop.f32.mrb[29].mxu1 }
 0x64d   : > { %v4243_v18 = vpop.f32.mrb[30].mxu1 }
 0x64e   : > { %4265 = vst.msk [vmem:[%s480_s24 + $0x8] sm:$0xf] %vm4264_vm2, %v4241_v17  ;;  %v4782_v19 = vpop.f32.mrb[31].mxu1 }
 0x64f PF: > { %s25_s29 = sadd.s32 1, %s5081_s29  }
 0x650   : > { %p22_p4 = scmp.ge.s32.totalorder %s25_s29, 4  }
 0x652   :  { %24 = sbr.rel (!%p22_p4) target bundleno = 6 (0x6), region = 138 }

</bundles_post_ra>
